<compile_context>
chip_gen: v7x
topology: tpu7x:2x2x1
jax: 0.10.0
libtpu: 0.0.40
codegen_flags: <defaults>
</compile_context>

<pallas_src>
import jax
import jax.numpy as jnp
from jax.experimental import pallas as pl
from jax.experimental.pallas import tpu as pltpu


def _kernel_nn2_kernel(
    x_ref, src_ref, tgt_ref, ea_ref,
    w1_ref, b1_ref, wk1_ref, bk1_ref, wk2_ref, bk2_ref,
    root_ref, bconv_ref, w2_ref, b2_ref,
    out_ref,
    h_sc, agg_sc, deg_sc,
):
    f32, bf16 = jnp.float32, jnp.bfloat16
    d = pl.program_id(0)                 # depth (outer, sequential)
    e = pl.program_id(1)                 # edge tile (inner, sequential accumulation)
    n_e = pl.num_programs(1)
    last_d = pl.num_programs(0) - 1

    N = h_sc.shape[0]
    TE, ker_in = ea_ref.shape

    # ---------- one-time init: fc1 (Linear 1 -> width) and zero in-degree ----------
    @pl.when((d == 0) & (e == 0))
    def _():
        h_sc[...] = x_ref[...] * w1_ref[...] + b1_ref[...]          # [N, width]
        deg_sc[...] = jnp.zeros_like(deg_sc)

    # ---------- per-layer init: zero the aggregation accumulator ----------
    @pl.when(e == 0)
    def _():
        agg_sc[...] = jnp.zeros_like(agg_sc)

    # ---------- edge-kernel MLP on this tile: DenseNet([ker_in, width//4, width], ReLU) ----
    ea = ea_ref[...]                                                # [TE, ker_in]
    wk1 = wk1_ref[...]                                              # [ker_in, width//4]
    # layer 1 (K=ker_in, N=width//4): broadcast FMAs on the VPU, no MXU push/pop.
    acc1 = ea[:, 0:1] * wk1[0:1, :]
    for kk in range(1, ker_in):
        acc1 = acc1 + ea[:, kk:kk + 1] * wk1[kk:kk + 1, :]
    hk = jnp.maximum(acc1 + bk1_ref[...], 0.0)                      # [TE, width//4]
    w_e = jnp.dot(hk, wk2_ref[...], preferred_element_type=f32) + bk2_ref[...]  # [TE, width]

    # ---------- per-tile one-hot gather / scatter (exact 0/1 -> bf16 MXU operands) -------
    src = src_ref[...]                                              # [TE, 1] int32
    tgt = tgt_ref[...]                                              # [1, TE] int32
    gather = jax.lax.broadcasted_iota(jnp.int32, (TE, N), 1) == src     # [TE, N] bool
    scatter = jax.lax.broadcasted_iota(jnp.int32, (N, TE), 0) == tgt    # [N, TE] bool

    # in-degree is depth-invariant -> accumulate it only on the first depth pass
    @pl.when(d == 0)
    def _():
        deg_sc[...] += jnp.sum(scatter.astype(f32), axis=1, keepdims=True)

    h_bf = h_sc[...].astype(bf16)                                   # [N, width]
    h_src = jnp.dot(gather.astype(bf16), h_bf,
                    preferred_element_type=f32)                     # [TE, width]  x[src_e]
    msg = w_e * h_src                                               # [TE, width]  (f32 VPU)
    agg_sc[...] += jnp.dot(scatter.astype(bf16), msg.astype(bf16),
                           preferred_element_type=f32)              # [N, width]  sum over edges

    # ---------- layer finalize: mean-normalize, root term, bias, ReLU ----------
    @pl.when(e == n_e - 1)
    def _():
        deg = deg_sc[...]                                           # [N, 1]
        inv_deg = jnp.where(deg > 0.0,
                            pl.reciprocal(jnp.maximum(deg, 1.0), approx=True),
                            0.0)
        h_sc[...] = jnp.maximum(
            agg_sc[...] * inv_deg
            + jnp.dot(h_sc[...], root_ref[...], preferred_element_type=f32)
            + bconv_ref[...],
            0.0,
        )

    # ---------- fc2 on the very last grid step, into a lane-dense [N, 128] slab ----------
    @pl.when((d == last_d) & (e == n_e - 1))
    def _():
        out_ref[...] = (jnp.dot(h_sc[...], w2_ref[...], preferred_element_type=f32)
                        + b2_ref[...])


def kernel_nn2_forward(x, edge_index, edge_attr, params, *, depth=4, edge_tile=128):
    N, in_width = x.shape
    assert in_width == 1, "KernelNN2 uses in_width=1"
    E, ker_in = edge_attr.shape
    width = params["root"].shape[0]
    LANES = 128

    # pad nodes to a sublane multiple and edges to a tile multiple
    N_pad = ((N + 7) // 8) * 8
    TE = edge_tile
    E_pad = ((E + TE - 1) // TE) * TE
    n_e = E_pad // TE

    xp = jnp.zeros((N_pad, 1), jnp.float32).at[:N, :].set(x.astype(jnp.float32))
    src = edge_index[0].astype(jnp.int32)
    tgt = edge_index[1].astype(jnp.int32)
    ea = edge_attr.astype(jnp.float32)
    if E_pad != E:
        pad = E_pad - E
        src = jnp.concatenate([src, jnp.zeros((pad,), jnp.int32)])
        # padded edges target an out-of-range node -> their scatter row is all-zero
        tgt = jnp.concatenate([tgt, jnp.full((pad,), N_pad, jnp.int32)])
        ea = jnp.concatenate([ea, jnp.zeros((pad, ker_in), jnp.float32)], axis=0)
    src = src.reshape(E_pad, 1)
    tgt = tgt.reshape(1, E_pad)

    # lane-pad the fc2 weights so the output store is a full 128-lane (unmasked) vst
    w2p = jnp.zeros((width, LANES), jnp.float32).at[:, :1].set(params["w2"])
    b2p = jnp.zeros((1, LANES), jnp.float32).at[:, :1].set(params["b2"])

    args = (xp, src, tgt, ea,
            params["w1"], params["b1"],
            params["wk1"], params["bk1"], params["wk2"], params["bk2"],
            params["root"], params["bconv"], w2p, b2p)

    const = lambda d, e: (0, 0)
    in_specs = [
        pl.BlockSpec((N_pad, 1), const),                      # x
        pl.BlockSpec((TE, 1), lambda d, e: (e, 0)),           # src (streamed per edge tile)
        pl.BlockSpec((1, TE), lambda d, e: (0, e)),           # tgt (streamed per edge tile)
        pl.BlockSpec((TE, ker_in), lambda d, e: (e, 0)),      # edge_attr (streamed)
        pl.BlockSpec((1, width), const),                      # w1
        pl.BlockSpec((1, width), const),                      # b1
        pl.BlockSpec((ker_in, width // 4), const),            # wk1
        pl.BlockSpec((1, width // 4), const),                 # bk1
        pl.BlockSpec((width // 4, width), const),             # wk2
        pl.BlockSpec((1, width), const),                      # bk2
        pl.BlockSpec((width, width), const),                  # root
        pl.BlockSpec((1, width), const),                      # bconv
        pl.BlockSpec((width, LANES), const),                  # w2 (lane-padded)
        pl.BlockSpec((1, LANES), const),                      # b2 (lane-padded)
    ]

    out = pl.pallas_call(
        _kernel_nn2_kernel,
        out_shape=jax.ShapeDtypeStruct((N_pad, LANES), jnp.float32),
        grid_spec=pltpu.PrefetchScalarGridSpec(
            num_scalar_prefetch=0,
            grid=(depth, n_e),
            in_specs=in_specs,
            out_specs=pl.BlockSpec((N_pad, LANES), const),
            scratch_shapes=[
                pltpu.VMEM((N_pad, width), jnp.float32),   # h   (node state, resident)
                pltpu.VMEM((N_pad, width), jnp.float32),   # agg (per-layer accumulator)
                pltpu.VMEM((N_pad, 1), jnp.float32),       # in-degree
            ],
        ),
        compiler_params=pltpu.CompilerParams(
            dimension_semantics=("arbitrary", "arbitrary")),
    )(*args)
    return out[:N, :1]


def init_params(key, *, width=32, ker_in=6, in_width=1):
    """Deterministic synthetic parameters matching the PyTorch module's shapes."""
    def linear(k, fan_in, fan_out):
        bound = 1.0 / jnp.sqrt(jnp.float32(fan_in))
        kw, kb = jax.random.split(k)
        w = jax.random.uniform(kw, (fan_in, fan_out), jnp.float32, -bound, bound)
        b = jax.random.uniform(kb, (1, fan_out), jnp.float32, -bound, bound)
        return w, b

    k = jax.random.split(key, 6)
    w1, b1 = linear(k[0], in_width, width)                 # fc1
    wk1, bk1 = linear(k[1], ker_in, width // 4)            # edge MLP layer 1
    wk2, bk2 = linear(k[2], width // 4, width)             # edge MLP layer 2
    rb = 1.0 / jnp.sqrt(jnp.float32(width))
    root = jax.random.uniform(k[3], (width, width), jnp.float32, -rb, rb)   # NNConv root
    bconv = jax.random.uniform(k[4], (1, width), jnp.float32, -rb, rb)      # NNConv bias
    w2, b2 = linear(k[5], width, 1)                        # fc2
    return dict(w1=w1, b1=b1, wk1=wk1, bk1=bk1, wk2=wk2, bk2=bk2,
                root=root, bconv=bconv, w2=w2, b2=b2)


def _reference_forward(x, edge_index, edge_attr, p, depth=4):
    """Pure-JAX f32 reference for validation."""
    src, tgt = edge_index[0], edge_index[1]
    N = x.shape[0]
    h = x * p["w1"] + p["b1"]
    hk = jnp.maximum(edge_attr @ p["wk1"] + p["bk1"], 0.0)
    w_e = hk @ p["wk2"] + p["bk2"]
    deg = jax.ops.segment_sum(jnp.ones_like(src, jnp.float32), tgt, num_segments=N)
    inv_deg = jnp.where(deg > 0, 1.0 / deg, 0.0)[:, None]
    for _ in range(depth):
        msg = w_e * h[src]
        agg = jax.ops.segment_sum(msg, tgt, num_segments=N) * inv_deg
        h = jnp.maximum(agg + h @ p["root"] + p["bconv"], 0.0)
    return h @ p["w2"] + p["b2"]


if __name__ == "__main__":
    N, E, ker_in, width, depth, in_width = 64, 256, 6, 32, 4, 1

    key = jax.random.PRNGKey(0)
    k_x, k_ei, k_ea, k_p = jax.random.split(key, 4)

    x = jax.random.normal(k_x, (N, in_width), jnp.float32)
    edge_index = jax.random.randint(k_ei, (2, E), 0, N, jnp.int32)
    edge_attr = jax.random.uniform(k_ea, (E, ker_in), jnp.float32)
    params = init_params(k_p, width=width, ker_in=ker_in, in_width=in_width)

    out = kernel_nn2_forward(x, edge_index, edge_attr, params, depth=depth, edge_tile=128)
    out = jax.block_until_ready(out)

    ref = _reference_forward(x, edge_index, edge_attr, params, depth=depth)
    assert out.shape == (N, 1)
    # bf16 MXU operands + approx reciprocal -> allow a modest tolerance vs the f32 reference
    assert jnp.allclose(out, ref, atol=5e-2, rtol=5e-2), "mismatch vs reference"

    print("KERNEL_OK")
</pallas_src>

<mosaic_0001>
module attributes {stable_mosaic.version = 11 : i64} {
  func.func @_kernel_nn2_kernel(%arg0: i32, %arg1: i32, %arg2: memref<64x1xf32, #tpu.memory_space<vmem>>, %arg3: memref<128x1xi32, #tpu.memory_space<vmem>>, %arg4: memref<1x128xi32, #tpu.memory_space<vmem>>, %arg5: memref<128x6xf32, #tpu.memory_space<vmem>>, %arg6: memref<1x32xf32, #tpu.memory_space<vmem>>, %arg7: memref<1x32xf32, #tpu.memory_space<vmem>>, %arg8: memref<6x8xf32, #tpu.memory_space<vmem>>, %arg9: memref<1x8xf32, #tpu.memory_space<vmem>>, %arg10: memref<8x32xf32, #tpu.memory_space<vmem>>, %arg11: memref<1x32xf32, #tpu.memory_space<vmem>>, %arg12: memref<32x32xf32, #tpu.memory_space<vmem>>, %arg13: memref<1x32xf32, #tpu.memory_space<vmem>>, %arg14: memref<32x128xf32, #tpu.memory_space<vmem>>, %arg15: memref<1x128xf32, #tpu.memory_space<vmem>>, %arg16: memref<64x128xf32, #tpu.memory_space<vmem>>, %arg17: memref<64x32xf32, #tpu.memory_space<vmem>>, %arg18: memref<64x32xf32, #tpu.memory_space<vmem>>, %arg19: memref<64x1xf32, #tpu.memory_space<vmem>>) attributes {dimension_semantics = [#tpu.dimension_semantics<arbitrary>, #tpu.dimension_semantics<arbitrary>], iteration_bounds = array<i64: 4, 2>, scalar_prefetch = 0 : i64, scratch_operands = 3 : i64, tpu.core_type = #tpu.core_type<tc>, window_params = [{pipeline_mode = #tpu.pipeline_mode<synchronous>, transform_indices = @transform_0, window_bounds = array<i64: 64, 1>}, {transform_indices = @transform_1, window_bounds = array<i64: 128, 1>}, {transform_indices = @transform_2, window_bounds = array<i64: 1, 128>}, {transform_indices = @transform_3, window_bounds = array<i64: 128, 6>}, {pipeline_mode = #tpu.pipeline_mode<synchronous>, transform_indices = @transform_4, window_bounds = array<i64: 1, 32>}, {pipeline_mode = #tpu.pipeline_mode<synchronous>, transform_indices = @transform_5, window_bounds = array<i64: 1, 32>}, {pipeline_mode = #tpu.pipeline_mode<synchronous>, transform_indices = @transform_6, window_bounds = array<i64: 6, 8>}, {pipeline_mode = #tpu.pipeline_mode<synchronous>, transform_indices = @transform_7, window_bounds = array<i64: 1, 8>}, {pipeline_mode = #tpu.pipeline_mode<synchronous>, transform_indices = @transform_8, window_bounds = array<i64: 8, 32>}, {pipeline_mode = #tpu.pipeline_mode<synchronous>, transform_indices = @transform_9, window_bounds = array<i64: 1, 32>}, {pipeline_mode = #tpu.pipeline_mode<synchronous>, transform_indices = @transform_10, window_bounds = array<i64: 32, 32>}, {pipeline_mode = #tpu.pipeline_mode<synchronous>, transform_indices = @transform_11, window_bounds = array<i64: 1, 32>}, {pipeline_mode = #tpu.pipeline_mode<synchronous>, transform_indices = @transform_12, window_bounds = array<i64: 32, 128>}, {pipeline_mode = #tpu.pipeline_mode<synchronous>, transform_indices = @transform_13, window_bounds = array<i64: 1, 128>}, {pipeline_mode = #tpu.pipeline_mode<synchronous>, transform_indices = @transform_14, window_bounds = array<i64: 64, 128>}]} {
    %c0_i32 = arith.constant 0 : i32
    %0 = arith.cmpi eq, %arg0, %c0_i32 : i32
    %c0_i32_0 = arith.constant 0 : i32
    %1 = arith.cmpi eq, %arg1, %c0_i32_0 : i32
    %2 = arith.andi %0, %1 : i1
    %3 = arith.extui %2 : i1 to i32
    %c0_i32_1 = arith.constant 0 : i32
    %4 = arith.cmpi ne, %3, %c0_i32_1 : i32
    scf.if %4 {
      %c0_31 = arith.constant 0 : index
      %c0_32 = arith.constant 0 : index
      %89 = vector.load %arg2[%c0_31, %c0_32] : memref<64x1xf32, #tpu.memory_space<vmem>>, vector<64x1xf32>
      %c0_33 = arith.constant 0 : index
      %c0_34 = arith.constant 0 : index
      %90 = vector.load %arg6[%c0_33, %c0_34] : memref<1x32xf32, #tpu.memory_space<vmem>>, vector<1x32xf32>
      %91 = vector.broadcast %89 : vector<64x1xf32> to vector<64x32xf32>
      %92 = vector.broadcast %90 : vector<1x32xf32> to vector<64x32xf32>
      %93 = arith.mulf %91, %92 : vector<64x32xf32>
      %c0_35 = arith.constant 0 : index
      %c0_36 = arith.constant 0 : index
      %94 = vector.load %arg7[%c0_35, %c0_36] : memref<1x32xf32, #tpu.memory_space<vmem>>, vector<1x32xf32>
      %95 = vector.broadcast %94 : vector<1x32xf32> to vector<64x32xf32>
      %96 = arith.addf %93, %95 : vector<64x32xf32>
      %c0_37 = arith.constant 0 : index
      %c0_38 = arith.constant 0 : index
      %97 = vector.load %arg17[%c0_37, %c0_38] : memref<64x32xf32, #tpu.memory_space<vmem>>, vector<64x32xf32>
      tpu.vector_store %arg17[%c0_37, %c0_38], %96 {strides = array<i32>} : memref<64x32xf32, #tpu.memory_space<vmem>>, vector<64x32xf32>,
      %cst_39 = arith.constant 0.000000e+00 : f32
      %98 = vector.broadcast %cst_39 : f32 to vector<64x1xf32>
      %c0_40 = arith.constant 0 : index
      %c0_41 = arith.constant 0 : index
      %99 = vector.load %arg19[%c0_40, %c0_41] : memref<64x1xf32, #tpu.memory_space<vmem>>, vector<64x1xf32>
      tpu.vector_store %arg19[%c0_40, %c0_41], %98 {strides = array<i32>} : memref<64x1xf32, #tpu.memory_space<vmem>>, vector<64x1xf32>,
    } else {
    }
    %c0_i32_2 = arith.constant 0 : i32
    %5 = arith.cmpi eq, %arg1, %c0_i32_2 : i32
    %6 = arith.extui %5 : i1 to i32
    %c0_i32_3 = arith.constant 0 : i32
    %7 = arith.cmpi ne, %6, %c0_i32_3 : i32
    scf.if %7 {
      %cst_31 = arith.constant 0.000000e+00 : f32
      %89 = vector.broadcast %cst_31 : f32 to vector<64x32xf32>
      %c0_32 = arith.constant 0 : index
      %c0_33 = arith.constant 0 : index
      %90 = vector.load %arg18[%c0_32, %c0_33] : memref<64x32xf32, #tpu.memory_space<vmem>>, vector<64x32xf32>
      tpu.vector_store %arg18[%c0_32, %c0_33], %89 {strides = array<i32>} : memref<64x32xf32, #tpu.memory_space<vmem>>, vector<64x32xf32>,
    } else {
    }
    %c0 = arith.constant 0 : index
    %c0_4 = arith.constant 0 : index
    %8 = vector.load %arg5[%c0, %c0_4] : memref<128x6xf32, #tpu.memory_space<vmem>>, vector<128x6xf32>
    %c0_5 = arith.constant 0 : index
    %c0_6 = arith.constant 0 : index
    %9 = vector.load %arg8[%c0_5, %c0_6] : memref<6x8xf32, #tpu.memory_space<vmem>>, vector<6x8xf32>
    %10 = vector.extract_strided_slice %8 {offsets = [0, 0], sizes = [128, 1], strides = [1, 1]} : vector<128x6xf32> to vector<128x1xf32>
    %11 = vector.extract_strided_slice %9 {offsets = [0, 0], sizes = [1, 8], strides = [1, 1]} : vector<6x8xf32> to vector<1x8xf32>
    %12 = vector.broadcast %10 : vector<128x1xf32> to vector<128x8xf32>
    %13 = vector.broadcast %11 : vector<1x8xf32> to vector<128x8xf32>
    %14 = arith.mulf %12, %13 : vector<128x8xf32>
    %15 = vector.extract_strided_slice %8 {offsets = [0, 1], sizes = [128, 1], strides = [1, 1]} : vector<128x6xf32> to vector<128x1xf32>
    %16 = vector.extract_strided_slice %9 {offsets = [1, 0], sizes = [1, 8], strides = [1, 1]} : vector<6x8xf32> to vector<1x8xf32>
    %17 = vector.broadcast %15 : vector<128x1xf32> to vector<128x8xf32>
    %18 = vector.broadcast %16 : vector<1x8xf32> to vector<128x8xf32>
    %19 = arith.mulf %17, %18 : vector<128x8xf32>
    %20 = arith.addf %14, %19 : vector<128x8xf32>
    %21 = vector.extract_strided_slice %8 {offsets = [0, 2], sizes = [128, 1], strides = [1, 1]} : vector<128x6xf32> to vector<128x1xf32>
    %22 = vector.extract_strided_slice %9 {offsets = [2, 0], sizes = [1, 8], strides = [1, 1]} : vector<6x8xf32> to vector<1x8xf32>
    %23 = vector.broadcast %21 : vector<128x1xf32> to vector<128x8xf32>
    %24 = vector.broadcast %22 : vector<1x8xf32> to vector<128x8xf32>
    %25 = arith.mulf %23, %24 : vector<128x8xf32>
    %26 = arith.addf %20, %25 : vector<128x8xf32>
    %27 = vector.extract_strided_slice %8 {offsets = [0, 3], sizes = [128, 1], strides = [1, 1]} : vector<128x6xf32> to vector<128x1xf32>
    %28 = vector.extract_strided_slice %9 {offsets = [3, 0], sizes = [1, 8], strides = [1, 1]} : vector<6x8xf32> to vector<1x8xf32>
    %29 = vector.broadcast %27 : vector<128x1xf32> to vector<128x8xf32>
    %30 = vector.broadcast %28 : vector<1x8xf32> to vector<128x8xf32>
    %31 = arith.mulf %29, %30 : vector<128x8xf32>
    %32 = arith.addf %26, %31 : vector<128x8xf32>
    %33 = vector.extract_strided_slice %8 {offsets = [0, 4], sizes = [128, 1], strides = [1, 1]} : vector<128x6xf32> to vector<128x1xf32>
    %34 = vector.extract_strided_slice %9 {offsets = [4, 0], sizes = [1, 8], strides = [1, 1]} : vector<6x8xf32> to vector<1x8xf32>
    %35 = vector.broadcast %33 : vector<128x1xf32> to vector<128x8xf32>
    %36 = vector.broadcast %34 : vector<1x8xf32> to vector<128x8xf32>
    %37 = arith.mulf %35, %36 : vector<128x8xf32>
    %38 = arith.addf %32, %37 : vector<128x8xf32>
    %39 = vector.extract_strided_slice %8 {offsets = [0, 5], sizes = [128, 1], strides = [1, 1]} : vector<128x6xf32> to vector<128x1xf32>
    %40 = vector.extract_strided_slice %9 {offsets = [5, 0], sizes = [1, 8], strides = [1, 1]} : vector<6x8xf32> to vector<1x8xf32>
    %41 = vector.broadcast %39 : vector<128x1xf32> to vector<128x8xf32>
    %42 = vector.broadcast %40 : vector<1x8xf32> to vector<128x8xf32>
    %43 = arith.mulf %41, %42 : vector<128x8xf32>
    %44 = arith.addf %38, %43 : vector<128x8xf32>
    %c0_7 = arith.constant 0 : index
    %c0_8 = arith.constant 0 : index
    %45 = vector.load %arg9[%c0_7, %c0_8] : memref<1x8xf32, #tpu.memory_space<vmem>>, vector<1x8xf32>
    %46 = vector.broadcast %45 : vector<1x8xf32> to vector<128x8xf32>
    %47 = arith.addf %44, %46 : vector<128x8xf32>
    %cst = arith.constant 0.000000e+00 : f32
    %48 = vector.broadcast %cst : f32 to vector<128x8xf32>
    %49 = arith.maximumf %47, %48 : vector<128x8xf32>
    %c0_9 = arith.constant 0 : index
    %c0_10 = arith.constant 0 : index
    %50 = vector.load %arg10[%c0_9, %c0_10] : memref<8x32xf32, #tpu.memory_space<vmem>>, vector<8x32xf32>
    %cst_11 = arith.constant dense<0.000000e+00> : vector<128x32xf32>
    %51 = tpu.matmul %49, %50, %cst_11 {dimension_numbers = #tpu.dot_dimension_numbers<[1], [0], [0], [1], [0, 0, 1, 1], [], []>} : vector<128x8xf32>, vector<8x32xf32>, vector<128x32xf32> -> vector<128x32xf32>
    %c0_12 = arith.constant 0 : index
    %c0_13 = arith.constant 0 : index
    %52 = vector.load %arg11[%c0_12, %c0_13] : memref<1x32xf32, #tpu.memory_space<vmem>>, vector<1x32xf32>
    %53 = vector.broadcast %52 : vector<1x32xf32> to vector<128x32xf32>
    %54 = arith.addf %51, %53 : vector<128x32xf32>
    %c0_14 = arith.constant 0 : index
    %c0_15 = arith.constant 0 : index
    %55 = vector.load %arg3[%c0_14, %c0_15] : memref<128x1xi32, #tpu.memory_space<vmem>>, vector<128x1xi32>
    %c0_16 = arith.constant 0 : index
    %c0_17 = arith.constant 0 : index
    %56 = vector.load %arg4[%c0_16, %c0_17] : memref<1x128xi32, #tpu.memory_space<vmem>>, vector<1x128xi32>
    %57 = tpu.iota {dimensions = array<i32: 1>} : vector<128x64xi32>
    %58 = vector.broadcast %55 : vector<128x1xi32> to vector<128x64xi32>
    %59 = arith.cmpi eq, %57, %58 : vector<128x64xi32>
    %60 = tpu.iota {dimensions = array<i32: 0>} : vector<64x128xi32>
    %61 = vector.broadcast %56 : vector<1x128xi32> to vector<64x128xi32>
    %62 = arith.cmpi eq, %60, %61 : vector<64x128xi32>
    %c0_i32_18 = arith.constant 0 : i32
    %63 = arith.cmpi eq, %arg0, %c0_i32_18 : i32
    %64 = arith.extui %63 : i1 to i32
    %c0_i32_19 = arith.constant 0 : i32
    %65 = arith.cmpi ne, %64, %c0_i32_19 : i32
    scf.if %65 {
      %c0_31 = arith.constant 0 : index
      %c0_32 = arith.constant 0 : index
      %89 = vector.load %arg19[%c0_31, %c0_32] : memref<64x1xf32, #tpu.memory_space<vmem>>, vector<64x1xf32>
      %90 = arith.extui %62 : vector<64x128xi1> to vector<64x128xi32>
      %91 = arith.sitofp %90 : vector<64x128xi32> to vector<64x128xf32>
      %cst_33 = arith.constant dense<0.000000e+00> : vector<64xf32>
      %92 = vector.multi_reduction <add>, %91, %cst_33 [1] : vector<64x128xf32> to vector<64xf32>
      %93 = vector.shape_cast %92 : vector<64xf32> to vector<64x1xf32>
      %94 = arith.addf %89, %93 : vector<64x1xf32>
      %c0_34 = arith.constant 0 : index
      %c0_35 = arith.constant 0 : index
      %95 = vector.load %arg19[%c0_34, %c0_35] : memref<64x1xf32, #tpu.memory_space<vmem>>, vector<64x1xf32>
      tpu.vector_store %arg19[%c0_34, %c0_35], %94 {strides = array<i32>} : memref<64x1xf32, #tpu.memory_space<vmem>>, vector<64x1xf32>,
    } else {
    }
    %c0_20 = arith.constant 0 : index
    %c0_21 = arith.constant 0 : index
    %66 = vector.load %arg17[%c0_20, %c0_21] : memref<64x32xf32, #tpu.memory_space<vmem>>, vector<64x32xf32>
    %67 = arith.truncf %66 : vector<64x32xf32> to vector<64x32xbf16>
    %68 = arith.extui %59 : vector<128x64xi1> to vector<128x64xi32>
    %69 = arith.sitofp %68 : vector<128x64xi32> to vector<128x64xf32>
    %70 = arith.truncf %69 : vector<128x64xf32> to vector<128x64xbf16>
    %cst_22 = arith.constant dense<0.000000e+00> : vector<128x32xf32>
    %71 = tpu.matmul %70, %67, %cst_22 {dimension_numbers = #tpu.dot_dimension_numbers<[1], [0], [0], [1], [0, 0, 1, 1], [], []>} : vector<128x64xbf16>, vector<64x32xbf16>, vector<128x32xf32> -> vector<128x32xf32>
    %72 = arith.mulf %54, %71 : vector<128x32xf32>
    %c0_23 = arith.constant 0 : index
    %c0_24 = arith.constant 0 : index
    %73 = vector.load %arg18[%c0_23, %c0_24] : memref<64x32xf32, #tpu.memory_space<vmem>>, vector<64x32xf32>
    %74 = arith.extui %62 : vector<64x128xi1> to vector<64x128xi32>
    %75 = arith.sitofp %74 : vector<64x128xi32> to vector<64x128xf32>
    %76 = arith.truncf %75 : vector<64x128xf32> to vector<64x128xbf16>
    %77 = arith.truncf %72 : vector<128x32xf32> to vector<128x32xbf16>
    %cst_25 = arith.constant dense<0.000000e+00> : vector<64x32xf32>
    %78 = tpu.matmul %76, %77, %cst_25 {dimension_numbers = #tpu.dot_dimension_numbers<[1], [0], [0], [1], [0, 0, 1, 1], [], []>} : vector<64x128xbf16>, vector<128x32xbf16>, vector<64x32xf32> -> vector<64x32xf32>
    %79 = arith.addf %73, %78 : vector<64x32xf32>
    %c0_26 = arith.constant 0 : index
    %c0_27 = arith.constant 0 : index
    %80 = vector.load %arg18[%c0_26, %c0_27] : memref<64x32xf32, #tpu.memory_space<vmem>>, vector<64x32xf32>
    tpu.vector_store %arg18[%c0_26, %c0_27], %79 {strides = array<i32>} : memref<64x32xf32, #tpu.memory_space<vmem>>, vector<64x32xf32>,
    %c1_i32 = arith.constant 1 : i32
    %81 = arith.cmpi eq, %arg1, %c1_i32 : i32
    %82 = arith.extui %81 : i1 to i32
    %c0_i32_28 = arith.constant 0 : i32
    %83 = arith.cmpi ne, %82, %c0_i32_28 : i32
    scf.if %83 {
      %c0_31 = arith.constant 0 : index
      %c0_32 = arith.constant 0 : index
      %89 = vector.load %arg19[%c0_31, %c0_32] : memref<64x1xf32, #tpu.memory_space<vmem>>, vector<64x1xf32>
      %cst_33 = arith.constant 0.000000e+00 : f32
      %90 = vector.broadcast %cst_33 : f32 to vector<64x1xf32>
      %91 = arith.cmpf ogt, %89, %90 : vector<64x1xf32>
      %cst_34 = arith.constant 1.000000e+00 : f32
      %92 = vector.broadcast %cst_34 : f32 to vector<64x1xf32>
      %93 = arith.maximumf %89, %92 : vector<64x1xf32>
      %94 = tpu.reciprocal %93 {approx = true} : vector<64x1xf32> -> vector<64x1xf32>
      %cst_35 = arith.constant 0.000000e+00 : f32
      %95 = vector.broadcast %cst_35 : f32 to vector<64x1xf32>
      %96 = arith.select %91, %94, %95 : vector<64x1xi1>, vector<64x1xf32>
      %c0_36 = arith.constant 0 : index
      %c0_37 = arith.constant 0 : index
      %97 = vector.load %arg18[%c0_36, %c0_37] : memref<64x32xf32, #tpu.memory_space<vmem>>, vector<64x32xf32>
      %98 = vector.broadcast %96 : vector<64x1xf32> to vector<64x32xf32>
      %99 = arith.mulf %97, %98 : vector<64x32xf32>
      %c0_38 = arith.constant 0 : index
      %c0_39 = arith.constant 0 : index
      %100 = vector.load %arg17[%c0_38, %c0_39] : memref<64x32xf32, #tpu.memory_space<vmem>>, vector<64x32xf32>
      %c0_40 = arith.constant 0 : index
      %c0_41 = arith.constant 0 : index
      %101 = vector.load %arg12[%c0_40, %c0_41] : memref<32x32xf32, #tpu.memory_space<vmem>>, vector<32x32xf32>
      %cst_42 = arith.constant dense<0.000000e+00> : vector<64x32xf32>
      %102 = tpu.matmul %100, %101, %cst_42 {dimension_numbers = #tpu.dot_dimension_numbers<[1], [0], [0], [1], [0, 0, 1, 1], [], []>} : vector<64x32xf32>, vector<32x32xf32>, vector<64x32xf32> -> vector<64x32xf32>
      %103 = arith.addf %99, %102 : vector<64x32xf32>
      %c0_43 = arith.constant 0 : index
      %c0_44 = arith.constant 0 : index
      %104 = vector.load %arg13[%c0_43, %c0_44] : memref<1x32xf32, #tpu.memory_space<vmem>>, vector<1x32xf32>
      %105 = vector.broadcast %104 : vector<1x32xf32> to vector<64x32xf32>
      %106 = arith.addf %103, %105 : vector<64x32xf32>
      %cst_45 = arith.constant 0.000000e+00 : f32
      %107 = vector.broadcast %cst_45 : f32 to vector<64x32xf32>
      %108 = arith.maximumf %106, %107 : vector<64x32xf32>
      %c0_46 = arith.constant 0 : index
      %c0_47 = arith.constant 0 : index
      %109 = vector.load %arg17[%c0_46, %c0_47] : memref<64x32xf32, #tpu.memory_space<vmem>>, vector<64x32xf32>
      tpu.vector_store %arg17[%c0_46, %c0_47], %108 {strides = array<i32>} : memref<64x32xf32, #tpu.memory_space<vmem>>, vector<64x32xf32>,
    } else {
    }
    %c3_i32 = arith.constant 3 : i32
    %84 = arith.cmpi eq, %arg0, %c3_i32 : i32
    %c1_i32_29 = arith.constant 1 : i32
    %85 = arith.cmpi eq, %arg1, %c1_i32_29 : i32
    %86 = arith.andi %84, %85 : i1
    %87 = arith.extui %86 : i1 to i32
    %c0_i32_30 = arith.constant 0 : i32
    %88 = arith.cmpi ne, %87, %c0_i32_30 : i32
    scf.if %88 {
      %c0_31 = arith.constant 0 : index
      %c0_32 = arith.constant 0 : index
      %89 = vector.load %arg17[%c0_31, %c0_32] : memref<64x32xf32, #tpu.memory_space<vmem>>, vector<64x32xf32>
      %c0_33 = arith.constant 0 : index
      %c0_34 = arith.constant 0 : index
      %90 = vector.load %arg14[%c0_33, %c0_34] : memref<32x128xf32, #tpu.memory_space<vmem>>, vector<32x128xf32>
      %cst_35 = arith.constant dense<0.000000e+00> : vector<64x128xf32>
      %91 = tpu.matmul %89, %90, %cst_35 {dimension_numbers = #tpu.dot_dimension_numbers<[1], [0], [0], [1], [0, 0, 1, 1], [], []>} : vector<64x32xf32>, vector<32x128xf32>, vector<64x128xf32> -> vector<64x128xf32>
      %c0_36 = arith.constant 0 : index
      %c0_37 = arith.constant 0 : index
      %92 = vector.load %arg15[%c0_36, %c0_37] : memref<1x128xf32, #tpu.memory_space<vmem>>, vector<1x128xf32>
      %93 = vector.broadcast %92 : vector<1x128xf32> to vector<64x128xf32>
      %94 = arith.addf %91, %93 : vector<64x128xf32>
      %c0_38 = arith.constant 0 : index
      %c0_39 = arith.constant 0 : index
      %95 = vector.load %arg16[%c0_38, %c0_39] : memref<64x128xf32, #tpu.memory_space<vmem>>, vector<64x128xf32>
      tpu.vector_store %arg16[%c0_38, %c0_39], %94 {strides = array<i32>} : memref<64x128xf32, #tpu.memory_space<vmem>>, vector<64x128xf32>,
    } else {
    }
    return
  }
  func.func @transform_0(%arg0: i32, %arg1: i32) -> (i32, i32) {
    %c0_i32 = arith.constant 0 : i32
    %c0_i32_0 = arith.constant 0 : i32
    %c0_i32_1 = arith.constant 0 : i32
    return %c0_i32, %c0_i32_0 : i32, i32
  }
  func.func @transform_1(%arg0: i32, %arg1: i32) -> (i32, i32) {
    %c0_i32 = arith.constant 0 : i32
    %c0_i32_0 = arith.constant 0 : i32
    return %arg1, %c0_i32 : i32, i32
  }
  func.func @transform_2(%arg0: i32, %arg1: i32) -> (i32, i32) {
    %c0_i32 = arith.constant 0 : i32
    %c0_i32_0 = arith.constant 0 : i32
    return %c0_i32, %arg1 : i32, i32
  }
  func.func @transform_3(%arg0: i32, %arg1: i32) -> (i32, i32) {
    %c0_i32 = arith.constant 0 : i32
    %c0_i32_0 = arith.constant 0 : i32
    return %arg1, %c0_i32 : i32, i32
  }
  func.func @transform_4(%arg0: i32, %arg1: i32) -> (i32, i32) {
    %c0_i32 = arith.constant 0 : i32
    %c0_i32_0 = arith.constant 0 : i32
    %c0_i32_1 = arith.constant 0 : i32
    return %c0_i32, %c0_i32_0 : i32, i32
  }
  func.func @transform_5(%arg0: i32, %arg1: i32) -> (i32, i32) {
    %c0_i32 = arith.constant 0 : i32
    %c0_i32_0 = arith.constant 0 : i32
    %c0_i32_1 = arith.constant 0 : i32
    return %c0_i32, %c0_i32_0 : i32, i32
  }
  func.func @transform_6(%arg0: i32, %arg1: i32) -> (i32, i32) {
    %c0_i32 = arith.constant 0 : i32
    %c0_i32_0 = arith.constant 0 : i32
    %c0_i32_1 = arith.constant 0 : i32
    return %c0_i32, %c0_i32_0 : i32, i32
  }
  func.func @transform_7(%arg0: i32, %arg1: i32) -> (i32, i32) {
    %c0_i32 = arith.constant 0 : i32
    %c0_i32_0 = arith.constant 0 : i32
    %c0_i32_1 = arith.constant 0 : i32
    return %c0_i32, %c0_i32_0 : i32, i32
  }
  func.func @transform_8(%arg0: i32, %arg1: i32) -> (i32, i32) {
    %c0_i32 = arith.constant 0 : i32
    %c0_i32_0 = arith.constant 0 : i32
    %c0_i32_1 = arith.constant 0 : i32
    return %c0_i32, %c0_i32_0 : i32, i32
  }
  func.func @transform_9(%arg0: i32, %arg1: i32) -> (i32, i32) {
    %c0_i32 = arith.constant 0 : i32
    %c0_i32_0 = arith.constant 0 : i32
    %c0_i32_1 = arith.constant 0 : i32
    return %c0_i32, %c0_i32_0 : i32, i32
  }
  func.func @transform_10(%arg0: i32, %arg1: i32) -> (i32, i32) {
    %c0_i32 = arith.constant 0 : i32
    %c0_i32_0 = arith.constant 0 : i32
    %c0_i32_1 = arith.constant 0 : i32
    return %c0_i32, %c0_i32_0 : i32, i32
  }
  func.func @transform_11(%arg0: i32, %arg1: i32) -> (i32, i32) {
    %c0_i32 = arith.constant 0 : i32
    %c0_i32_0 = arith.constant 0 : i32
    %c0_i32_1 = arith.constant 0 : i32
    return %c0_i32, %c0_i32_0 : i32, i32
  }
  func.func @transform_12(%arg0: i32, %arg1: i32) -> (i32, i32) {
    %c0_i32 = arith.constant 0 : i32
    %c0_i32_0 = arith.constant 0 : i32
    %c0_i32_1 = arith.constant 0 : i32
    return %c0_i32, %c0_i32_0 : i32, i32
  }
  func.func @transform_13(%arg0: i32, %arg1: i32) -> (i32, i32) {
    %c0_i32 = arith.constant 0 : i32
    %c0_i32_0 = arith.constant 0 : i32
    %c0_i32_1 = arith.constant 0 : i32
    return %c0_i32, %c0_i32_0 : i32, i32
  }
  func.func @transform_14(%arg0: i32, %arg1: i32) -> (i32, i32) {
    %c0_i32 = arith.constant 0 : i32
    %c0_i32_0 = arith.constant 0 : i32
    %c0_i32_1 = arith.constant 0 : i32
    return %c0_i32, %c0_i32_0 : i32, i32
  }
}

</mosaic_0001>

<bundles_post_ra>
// kernel: tpu_custom_call.1
= control target key start
LH: loop header
LB: loop body
LE: loop exit
PB: predicated region body
PF: predicated region fallthrough
CT: control target
= control target key end

     0   :  { %s4030_s0 = inlined_call_operand.vmem [shape: f32[64,1], index: 0, kind: input, shape index: {}]   ;;  %s4031_s1 = inlined_call_operand.vmem [shape: s32[256,1], index: 1, kind: input, shape index: {}]   ;;  %s4032_s2 = inlined_call_operand.vmem [shape: s32[1,256], index: 2, kind: input, shape index: {}]   ;;  %s4033_s3 = inlined_call_operand.vmem [shape: f32[256,6], index: 3, kind: input, shape index: {}]   ;;  %s4034_s4 = inlined_call_operand.vmem [shape: f32[1,32], index: 4, kind: input, shape index: {}]   ;;  %s4035_s5 = inlined_call_operand.vmem [shape: f32[1,32], index: 5, kind: input, shape index: {}]   ;;  %s4036_s6 = inlined_call_operand.vmem [shape: f32[6,8], index: 6, kind: input, shape index: {}]   ;;  %s4037_s7 = inlined_call_operand.vmem [shape: f32[1,8], index: 7, kind: input, shape index: {}]   ;;  %s4038_s8 = inlined_call_operand.vmem [shape: f32[8,32], index: 8, kind: input, shape index: {}]   ;;  %s4039_s9 = inlined_call_operand.vmem [shape: f32[1,32], index: 9, kind: input, shape index: {}]   ;;  %s4040_s10 = inlined_call_operand.vmem [shape: f32[32,32], index: 10, kind: input, shape index: {}]   ;;  %s4041_s11 = inlined_call_operand.vmem [shape: f32[1,32], index: 11, kind: input, shape index: {}]   ;;  %s4042_s12 = inlined_call_operand.vmem [shape: f32[32,128], index: 12, kind: input, shape index: {}]   ;;  %s4043_s13 = inlined_call_operand.vmem [shape: f32[1,128], index: 13, kind: input, shape index: {}]   ;;  %s4044_s14 = inlined_call_operand.hbm [shape: f32[64,128], index: 14, kind: output, shape index: {}]  }
   0x1   :  { %4050 = sst [smem:[#allocation12_spill]] %s4044_s14 }
   0x2   :  { %19 = vsyncpa [#allocation6], 0  ;;  %s3061_s29 = smov 0   ;;  %s3063_s30 = smov 0  }
   0x3   :  { %s3065_s15 = smov 0   ;;  %s3067_s16 = smov 0  }
   0x4   :  { %s3069_s17 = smov 0  }
   0x5 LB: > { %4051 = sst [smem:[#allocation8_spill]] %s2960_s15  ;;  %s34_s19 = sadd.s32 1, %s2960_s15  ;;  %s2968_s17 = sphi %s3069_s17, %s25_s17   ;;  %s2964_s16 = sphi %s3067_s16, %s4071_s16   ;;  %s2960_s15 = sphi %s3065_s15, %s4070_s15   ;;  %s2956_s30 = sphi %s3063_s30, %s4069_s30   ;;  %s2952_s29 = sphi %s3061_s29, %s4068_s29  }
   0x6   : > { %4052 = sst [smem:[#allocation9_spill]] %s2964_s16  ;;  %p35_p0 = scmp.ge.s32.totalorder %s34_s19, 2 }
   0x7   : > { %s37_s20 = sadd.s32 1, %s2964_s16  ;;  %p2474_p1 = scmp.ge.s32.totalorder %s2968_s17, 1 }
   0x8   : > { %p440_p2 = scmp.lt.s32.totalorder %s2968_s17, 9  ;;  %s4073_s19 = smov (%p35_p0, %s34_s19), 0 }
   0x9   : > { %4053 = sst [smem:[#allocation10_spill]] %s4073_s19  ;;  %s4075_s20 = smov (!%p35_p0, %s37_s20), %s2964_s16 }
   0xa   : > { %p441_p3 = pnand %p2474_p1, %p440_p2  ;;  %p39_p4 = scmp.ge.s32.totalorder %s4075_s20, 4 }
   0xb   : > { %s2475_s21 = sshll.u32 (!%p441_p3), %s2952_s29, 4  ;;  %p495_p5 = scmp.lt.s32.totalorder (!%p441_p3), %s2952_s29, 1 }
   0xc   : > { %s4077_s20 = smov (%p39_p4, %s4075_s20), 0  ;;  %444 = sbr.rel (%p441_p3) target bundleno = 1831 (0x727), region = 76 }
   0xd   : > { %4054 = sst [smem:[#allocation11_spill]] %s4077_s20  ;;  %p490_p6 = scmp.lt.s32.totalorder (!%p441_p3), %s2475_s21, 31 }
   0xe   : > { %p505_p7 = scmp.eq.s32.totalorder (!%p441_p3), %s2956_s30, 0  ;;  %p506_p8 = scmp.eq.s32.totalorder (!%p441_p3), %s2952_s29, 0 }
  0x10   : > { %p507_p9 = pnand (!%p441_p3), %p506_p8, %p505_p7 }
  0x13   : > { %s3100_s22 = scalar_select %p495_p5, %s2952_s29, 1 }
  0x14   : > { %s4079_s21 = smov (!%p490_p6, %s2475_s21), 31  ;;  %510 = sbr.rel (%p507_p9) target bundleno = 168 (0xa8), region = 80 }
  0x15   : > { %s497_s25 = scalar_lea.vmem %s4032_s2, %s3100_s22  ;;  %s2476_s26 = sshll.u32 %s4079_s21, 3  ;;  %v513_v0 = vld [vmem:[%s4030_s0 + $0x10] sm:$0xff] (!%p507_p9)  ;;  %v511_v1 = vld [vmem:[%s4030_s0] sm:$0xff] (!%p507_p9)  ;;  %v2970_v2 = vmov (!%p507_p9), 0   ;;  %v514_v3 = vld [vmem:[%s4030_s0 + $0x18] sm:$0xff] (!%p507_p9)  ;;  %vm598_vm0 = vcmask (!%p507_p9), 7168  }
  0x16   : > { %s3110_s18 = scalar_lea.vmem %s4031_s1, %s2476_s26  ;;  %s3115_s16 = scalar_lea.vmem %s4033_s3, %s2476_s26  ;;  %2839 = vset.pattern.permute.xlu1 (!%p507_p9), %v2970_v2  ;;  %2838 = vset.pattern.permute.xlu0 (!%p507_p9), %v2970_v2  ;;  %v512_v4 = vld [vmem:[%s4030_s0 + $0x8] sm:$0xff] (!%p507_p9)  ;;  %v515_v6 = vld [vmem:[%s4030_s0 + $0x20] sm:$0xff] (!%p507_p9)  ;;  %v518_v7 = vld [vmem:[%s4030_s0 + $0x38] sm:$0xff] (!%p507_p9)  ;;  %v2971_v9 = vmov (!%p507_p9), 0.0   ;;  %vm589_vm1 = vcmask (!%p507_p9), 261120  }
  0x17   : > { %532 = vperm.xlu1 (!%p507_p9), %2839, %v513_v0   ;;  %522 = vperm.xlu0 (!%p507_p9), %2838, %v511_v1   ;;  %v516_v5 = vld [vmem:[%s4030_s0 + $0x28] sm:$0xff] (!%p507_p9)  ;;  %v517_v8 = vld [vmem:[%s4030_s0 + $0x30] sm:$0xff] (!%p507_p9)  ;;  %599 = vst.msk [vmem:[#allocation4] sm:$0xff] (!%p507_p9), %vm598_vm0, %v2971_v9  ;;  %600 = vst.msk [vmem:[#allocation4 + $0x8] sm:$0xff] (!%p507_p9), %vm598_vm0, %v2971_v9 }
  0x18   : > { %601 = vst.msk [vmem:[#allocation4 + $0x10] sm:$0xff] (!%p507_p9), %vm598_vm0, %v2971_v9  ;;  %602 = vst.msk [vmem:[#allocation4 + $0x18] sm:$0xff] (!%p507_p9), %vm598_vm0, %v2971_v9  ;;  %v2479_v10 = vld [vmem:[%s4034_s4] ss:$0 sm:$0xff] (!%p507_p9) }
  0x19   : > { %603 = vst.msk [vmem:[#allocation4 + $0x20] sm:$0xff] (!%p507_p9), %vm598_vm0, %v2971_v9  ;;  %604 = vst.msk [vmem:[#allocation4 + $0x28] sm:$0xff] (!%p507_p9), %vm598_vm0, %v2971_v9  ;;  %v2480_v11 = vld [vmem:[%s4035_s5] ss:$0 sm:$0xff] (!%p507_p9) }
  0x1a   : > { %605 = vst.msk [vmem:[#allocation4 + $0x30] sm:$0xff] (!%p507_p9), %vm598_vm0, %v2971_v9  ;;  %606 = vst.msk [vmem:[#allocation4 + $0x38] sm:$0xff] (!%p507_p9), %vm598_vm0, %v2971_v9 }
  0x1b   : > { %537 = vperm.xlu1 %2839, %v514_v3   ;;  %527 = vperm.xlu0 %2838, %v512_v4  }
  0x1f   : > { %547 = vperm.xlu1 %2839, %v516_v5   ;;  %542 = vperm.xlu0 %2838, %v515_v6  }
  0x23   : > { %557 = vperm.xlu1 %2839, %v518_v7   ;;  %552 = vperm.xlu0 %2838, %v517_v8  }
  0x96   : > { %v533_v12 = vpop.permute.xlu1 %532  ;;  %v523_v13 = vpop.permute.xlu0 %522 }
  0x97   : > { %v568_v14 = vmul.f32 %v2479_v10, %v533_v12  ;;  %v566_v15 = vmul.f32 %v2479_v10, %v523_v13 }
  0x99   : > { %v583_v16 = vadd.f32 %v2480_v11, %v568_v14  ;;  %v581_v17 = vadd.f32 %v2480_v11, %v566_v15 }
  0x9a   : > { %v538_v18 = vpop.permute.xlu1 %537  ;;  %v528_v19 = vpop.permute.xlu0 %527 }
  0x9b   : > { %592 = vst.msk [vmem:[#allocation2 + $0x10] sm:$0xff] %vm589_vm1, %v583_v16  ;;  %590 = vst.msk [vmem:[#allocation2] sm:$0xff] %vm589_vm1, %v581_v17  ;;  %v569_v20 = vmul.f32 %v2479_v10, %v538_v18  ;;  %v567_v21 = vmul.f32 %v2479_v10, %v528_v19 }
  0x9d   : > { %v584_v22 = vadd.f32 %v2480_v11, %v569_v20  ;;  %v582_v23 = vadd.f32 %v2480_v11, %v567_v21 }
  0x9e   : > { %v548_v24 = vpop.permute.xlu1 %547  ;;  %v543_v25 = vpop.permute.xlu0 %542 }
  0x9f   : > { %593 = vst.msk [vmem:[#allocation2 + $0x18] sm:$0xff] %vm589_vm1, %v584_v22  ;;  %591 = vst.msk [vmem:[#allocation2 + $0x8] sm:$0xff] %vm589_vm1, %v582_v23  ;;  %v571_v26 = vmul.f32 %v2479_v10, %v548_v24  ;;  %v570_v27 = vmul.f32 %v2479_v10, %v543_v25 }
  0xa1   : > { %v586_v28 = vadd.f32 %v2480_v11, %v571_v26  ;;  %v585_v29 = vadd.f32 %v2480_v11, %v570_v27 }
  0xa2   : > { %v558_v30 = vpop.permute.xlu1 %557  ;;  %v553_v31 = vpop.permute.xlu0 %552 }
  0xa3   : > { %595 = vst.msk [vmem:[#allocation2 + $0x28] sm:$0xff] %vm589_vm1, %v586_v28  ;;  %594 = vst.msk [vmem:[#allocation2 + $0x20] sm:$0xff] %vm589_vm1, %v585_v29  ;;  %v573_v32 = vmul.f32 %v2479_v10, %v558_v30  ;;  %v572_v33 = vmul.f32 %v2479_v10, %v553_v31 }
  0xa5   : > { %v588_v34 = vadd.f32 %v2480_v11, %v573_v32  ;;  %v587_v35 = vadd.f32 %v2480_v11, %v572_v33 }
  0xa7   : > { %597 = vst.msk [vmem:[#allocation2 + $0x38] sm:$0xff] %vm589_vm1, %v588_v34  ;;  %596 = vst.msk [vmem:[#allocation2 + $0x30] sm:$0xff] %vm589_vm1, %v587_v35 }
  0xa8 PF: > { %p2481_p10 = scmp.ne.s32.totalorder %s2952_s29, 0 }
  0xa9   : > { %vm610_vm2 = vcmask (!%p2481_p10), 261120   ;;  %v2972_v36 = vmov (!%p2481_p10), 0.0  }
  0xaa   : > { %609 = sbr.rel (%p2481_p10) target bundleno = 177 (0xb1), region = 84  ;;  %611 = vst.msk [vmem:[#allocation3] sm:$0xff] (!%p2481_p10), %vm610_vm2, %v2972_v36  ;;  %612 = vst.msk [vmem:[#allocation3 + $0x8] sm:$0xff] (!%p2481_p10), %vm610_vm2, %v2972_v36 }
  0xab   : > { %613 = vst.msk [vmem:[#allocation3 + $0x10] sm:$0xff] (!%p2481_p10), %vm610_vm2, %v2972_v36  ;;  %614 = vst.msk [vmem:[#allocation3 + $0x18] sm:$0xff] (!%p2481_p10), %vm610_vm2, %v2972_v36 }
  0xac   : > { %615 = vst.msk [vmem:[#allocation3 + $0x20] sm:$0xff] (!%p2481_p10), %vm610_vm2, %v2972_v36  ;;  %616 = vst.msk [vmem:[#allocation3 + $0x28] sm:$0xff] (!%p2481_p10), %vm610_vm2, %v2972_v36 }
  0xad   : > { %617 = vst.msk [vmem:[#allocation3 + $0x30] sm:$0xff] (!%p2481_p10), %vm610_vm2, %v2972_v36  ;;  %618 = vst.msk [vmem:[#allocation3 + $0x38] sm:$0xff] (!%p2481_p10), %vm610_vm2, %v2972_v36 }
  0xb1 PF: > { %v3157_v37 = vld [vmem:[%s3115_s16 + $0x10] sm:$0xff]  ;;  %v3160_v38 = vld [vmem:[%s3115_s16] sm:$0xff]  ;;  %v2973_v39 = vmov 0   ;;  %v3167_v40 = vld [vmem:[%s3115_s16 + $0x18] sm:$0xff]  ;;  %v2974_v54 = vmov 1   ;;  %v2975_v55 = vmov 2   ;;  %v716_v60 = vlaneseq }
  0xb2   : > { %2841 = vset.pattern.permute.xlu1 %v2973_v39  ;;  %2840 = vset.pattern.permute.xlu0 %v2973_v39  ;;  %v3170_v41 = vld [vmem:[%s3115_s16 + $0x8] sm:$0xff]  ;;  %v3178_v43 = vld [vmem:[%s3115_s16 + $0x20] sm:$0xff]  ;;  %v3183_v44 = vld [vmem:[%s3115_s16 + $0x38] sm:$0xff]  ;;  %v2976_v56 = vmov 5   ;;  %v2977_v57 = vmov 3   ;;  %v2978_v58 = vmov 4  }
  0xb3   : > { %648 = vperm.xlu1 %2841, %v3157_v37   ;;  %638 = vperm.xlu0 %2840, %v3160_v38   ;;  %v3175_v42 = vld [vmem:[%s3115_s16 + $0x28] sm:$0xff]  ;;  %v3186_v45 = vld [vmem:[%s3115_s16 + $0x30] sm:$0xff]  ;;  %v3194_v47 = vld [vmem:[%s3115_s16 + $0x40] sm:$0xff]  ;;  %v3290_v63 = vshrl.u32 %v716_v60, 7  ;;  %vm1283_vm3 = vcmask 64512   ;;  %p2501_p11 = scmp.ne.s32.totalorder %s2956_s30, 0 }
  0xb4   : > { %v3191_v46 = vld [vmem:[%s3115_s16 + $0x48] sm:$0xff]  ;;  %v3199_v48 = vld [vmem:[%s3115_s16 + $0x58] sm:$0xff]  ;;  %v3202_v49 = vld [vmem:[%s3115_s16 + $0x50] sm:$0xff] }
  0xb5   : > { %v3207_v50 = vld [vmem:[%s3115_s16 + $0x68] sm:$0xff]  ;;  %v3210_v51 = vld [vmem:[%s3115_s16 + $0x60] sm:$0xff]  ;;  %v3215_v52 = vld [vmem:[%s3115_s16 + $0x78] sm:$0xff]  ;;  %v718_v2 = vsub.s32 0, %v3290_v63  ;;  %v802_v26 = vsub.s32 1, %v3290_v63 }
  0xb6   : > { %v3218_v53 = vld [vmem:[%s3115_s16 + $0x70] sm:$0xff]  ;;  %v1275_v59 = vld [vmem:[%s4038_s8] sm:$0xff] }
  0xb7   : > { %653 = vperm.xlu1 %2841, %v3167_v40   ;;  %643 = vperm.xlu0 %2840, %v3170_v41   ;;  %v3303_v3 = vld [vmem:[%s4036_s6] sm:$0x3f] }
  0xb8   : > { %2638 = vmatprep.subr.mxu0 %v1275_v59  ;;  %v3313_v6 = vrot.slane %v3303_v3, %v718_v2  ;;  %v3352_v29 = vrot.slane %v3303_v3, %v802_v26 }
  0xb9   : > { %2639 = vmatpush3.msra.mxu0 %v1275_v59 }
  0xbb   : > { %663 = vperm.xlu1 %2841, %v3175_v42   ;;  %658 = vperm.xlu0 %2840, %v3178_v43  }
  0xbf   : > { %673 = vperm.xlu1 %2841, %v3183_v44   ;;  %668 = vperm.xlu0 %2840, %v3186_v45  }
  0xc3   : > { %683 = vperm.xlu1 %2841, %v3191_v46   ;;  %678 = vperm.xlu0 %2840, %v3194_v47  }
  0xc7   : > { %693 = vperm.xlu1 %2841, %v3199_v48   ;;  %688 = vperm.xlu0 %2840, %v3202_v49  }
  0xcb   : > { %703 = vperm.xlu1 %2841, %v3207_v50   ;;  %698 = vperm.xlu0 %2840, %v3210_v51  }
  0xcf   : > { %713 = vperm.xlu1 %2841, %v3215_v52   ;;  %708 = vperm.xlu0 %2840, %v3218_v53  }
  0xd3   : > { %2843 = vset.pattern.permute.xlu1 %v2974_v54  ;;  %2842 = vset.pattern.permute.xlu0 %v2974_v54 }
  0xd4   : > { %741 = vperm.xlu1 %2843, %v3170_v41   ;;  %737 = vperm.xlu0 %2842, %v3160_v38  }
  0xd8   : > { %745 = vperm.xlu1 %2843, %v3157_v37   ;;  %749 = vperm.xlu0 %2842, %v3167_v40  }
  0xdc   : > { %753 = vperm.xlu1 %2843, %v3178_v43   ;;  %757 = vperm.xlu0 %2842, %v3175_v42  }
  0xe0   : > { %761 = vperm.xlu1 %2843, %v3186_v45   ;;  %765 = vperm.xlu0 %2842, %v3183_v44  }
  0xe4   : > { %769 = vperm.xlu1 %2843, %v3194_v47   ;;  %773 = vperm.xlu0 %2842, %v3191_v46  }
  0xe8   : > { %777 = vperm.xlu1 %2843, %v3202_v49   ;;  %781 = vperm.xlu0 %2842, %v3199_v48  }
  0xec   : > { %785 = vperm.xlu1 %2843, %v3210_v51   ;;  %789 = vperm.xlu0 %2842, %v3207_v50  }
  0xf0   : > { %793 = vperm.xlu1 %2843, %v3218_v53   ;;  %797 = vperm.xlu0 %2842, %v3215_v52  }
  0xf4   : > { %2844 = vset.pattern.permute.xlu1 %v2975_v55  ;;  %2849 = vset.pattern.permute.xlu0 %v2976_v56 }
  0xf5   : > { %837 = vperm.xlu1 %2844, %v3160_v38   ;;  %1141 = vperm.xlu0 %2849, %v3170_v41  }
  0xf9   : > { %2845 = vset.pattern.permute.xlu1 %v2977_v57  ;;  %1145 = vperm.xlu0 %2849, %v3157_v37  }
  0xfa   : > { %937 = vperm.xlu1 %2845, %v3160_v38  }
  0xfd   : > { %1165 = vperm.xlu0 %2849, %v3183_v44  }
  0xfe   : > { %941 = vperm.xlu1 %2845, %v3170_v41  }
 0x101   : > { %1169 = vperm.xlu0 %2849, %v3194_v47  }
 0x102   : > { %2846 = vset.pattern.permute.xlu1 %v2978_v58 }
 0x103   : > { %1037 = vperm.xlu1 %2846, %v3160_v38  }
 0x105   : > { %2865 = vset.pattern.permute.xlu0 %v2975_v55 }
 0x106   : > { %841 = vperm.xlu0 %2865, %v3170_v41  }
 0x107   : > { %1041 = vperm.xlu1 %2846, %v3170_v41  }
 0x10a   : > { %845 = vperm.xlu0 %2865, %v3157_v37  }
 0x10b   : > { %2847 = vset.pattern.permute.xlu1 %v2976_v56 }
 0x10c   : > { %1137 = vperm.xlu1 %2847, %v3160_v38  }
 0x10e   : > { %849 = vperm.xlu0 %2865, %v3167_v40  }
 0x110   : > { %2848 = vset.pattern.permute.xlu1 %v2977_v57 }
 0x111   : > { %949 = vperm.xlu1 %2848, %v3167_v40  }
 0x112   : > { %857 = vperm.xlu0 %2865, %v3175_v42  }
 0x115   : > { %2850 = vset.pattern.permute.xlu1 %v2975_v55 }
 0x116   : > { %853 = vperm.xlu1 %2850, %v3178_v43   ;;  %861 = vperm.xlu0 %2865, %v3186_v45  }
 0x11a   : > { %2851 = vset.pattern.permute.xlu1 %v2978_v58  ;;  %881 = vperm.xlu0 %2865, %v3199_v48  }
 0x11b   : > { %1045 = vperm.xlu1 %2851, %v3157_v37  }
 0x11e   : > { %885 = vperm.xlu0 %2865, %v3210_v51  }
 0x11f   : > { %1049 = vperm.xlu1 %2851, %v3167_v40  }
 0x122   : > { %2867 = vset.pattern.permute.xlu0 %v2978_v58 }
 0x123   : > { %2852 = vset.pattern.permute.xlu1 %v2977_v57  ;;  %1057 = vperm.xlu0 %2867, %v3175_v42  }
 0x124   : > { %953 = vperm.xlu1 %2852, %v3178_v43  }
 0x127   : > { %1061 = vperm.xlu0 %2867, %v3186_v45  }
 0x128   : > { %957 = vperm.xlu1 %2852, %v3175_v42  }
 0x12b   : > { %1081 = vperm.xlu0 %2867, %v3199_v48  }
 0x12c   : > { %2853 = vset.pattern.permute.xlu1 %v2976_v56 }
 0x12d   : > { %1149 = vperm.xlu1 %2853, %v3167_v40  }
 0x12f   : > { %1085 = vperm.xlu0 %2867, %v3210_v51  }
 0x131   : > { %2854 = vset.pattern.permute.xlu1 %v2978_v58 }
 0x132   : > { %v3282_v61 = vpop.permute.xlu1 %648  ;;  %1053 = vperm.xlu1 %2854, %v3178_v43   ;;  %v3285_v62 = vpop.permute.xlu0 %638 }
 0x133   : > { %2873 = vset.pattern.permute.xlu0 %v2977_v57 }
 0x134   : > { %945 = vperm.xlu0 %2873, %v3157_v37  }
 0x136   : > { %v3292_v0 = vpop.permute.xlu1 %653  ;;  %2855 = vset.pattern.permute.xlu1 %v2975_v55  ;;  %v3295_v1 = vpop.permute.xlu0 %643 }
 0x137   : > { %865 = vperm.xlu1 %2855, %v3183_v44  }
 0x138   : > { %965 = vperm.xlu0 %2873, %v3183_v44  }
 0x13a   : > { %v3305_v4 = vpop.permute.xlu1 %663  ;;  %v3307_v5 = vpop.permute.xlu0 %658 }
 0x13b   : > { %2856 = vset.pattern.permute.xlu1 %v2977_v57 }
 0x13c   : > { %961 = vperm.xlu1 %2856, %v3186_v45   ;;  %969 = vperm.xlu0 %2873, %v3194_v47  }
 0x13e   : > { %v674_v7 = vpop.permute.xlu1 %673  ;;  %v669_v8 = vpop.permute.xlu0 %668 }
 0x13f   : > { %v726_v9 = vmul.f32 %v3313_v6, %v669_v8  ;;  %v727_v32 = vmul.f32 %v3313_v6, %v674_v7 }
 0x140   : > { %2857 = vset.pattern.permute.xlu1 %v2976_v56  ;;  %989 = vperm.xlu0 %2873, %v3207_v50  }
 0x141   : > { %1153 = vperm.xlu1 %2857, %v3178_v43  }
 0x142   : > { %v684_v10 = vpop.permute.xlu1 %683  ;;  %v679_v11 = vpop.permute.xlu0 %678 }
 0x143   : > { %v728_v12 = vmul.f32 %v3313_v6, %v679_v11  ;;  %v729_v40 = vmul.f32 %v3313_v6, %v684_v10 }
 0x144   : > { %993 = vperm.xlu0 %2873, %v3218_v53  }
 0x145   : > { %1157 = vperm.xlu1 %2857, %v3175_v42  }
 0x146   : > { %v694_v13 = vpop.permute.xlu1 %693  ;;  %v689_v14 = vpop.permute.xlu0 %688 }
 0x147   : > { %v730_v15 = vmul.f32 %v3313_v6, %v689_v14  ;;  %v731_v59 = vmul.f32 %v3313_v6, %v694_v13 }
 0x148   : > { %2877 = vset.pattern.permute.xlu0 %v2976_v56 }
 0x149   : > { %2858 = vset.pattern.permute.xlu1 %v2975_v55  ;;  %1189 = vperm.xlu0 %2877, %v3207_v50  }
 0x14a   : > { %v704_v16 = vpop.permute.xlu1 %703  ;;  %869 = vperm.xlu1 %2858, %v3194_v47   ;;  %v699_v17 = vpop.permute.xlu0 %698 }
 0x14b   : > { %v732_v18 = vmul.f32 %v3313_v6, %v699_v17 }
 0x14d   : > { %1193 = vperm.xlu0 %2877, %v3218_v53  }
 0x14e   : > { %v714_v19 = vpop.permute.xlu1 %713  ;;  %873 = vperm.xlu1 %2858, %v3191_v46   ;;  %v709_v20 = vpop.permute.xlu0 %708 }
 0x14f   : > { %v734_v21 = vmul.f32 %v3313_v6, %v709_v20  ;;  %v735_v26 = vmul.f32 %v3313_v6, %v714_v19 }
 0x151   : > { %2880 = vset.pattern.permute.xlu0 %v2973_v39 }
 0x152   : > { %2859 = vset.pattern.permute.xlu1 %v2978_v58 }
 0x153   : > { %v3333_v22 = vpop.permute.xlu1 %741  ;;  %1065 = vperm.xlu1 %2859, %v3183_v44   ;;  %v3336_v23 = vpop.permute.xlu0 %737 }
 0x157   : > { %v3338_v24 = vpop.permute.xlu1 %745  ;;  %2860 = vset.pattern.permute.xlu1 %v2976_v56  ;;  %v3341_v25 = vpop.permute.xlu0 %749 }
 0x158   : > { %1161 = vperm.xlu1 %2860, %v3186_v45  }
 0x15b   : > { %v3345_v27 = vpop.permute.xlu1 %753  ;;  %v3347_v28 = vpop.permute.xlu0 %757 }
 0x15c   : > { %2861 = vset.pattern.permute.xlu1 %v2977_v57 }
 0x15d   : > { %973 = vperm.xlu1 %2861, %v3191_v46  }
 0x15f   : > { %v762_v30 = vpop.permute.xlu1 %761  ;;  %v766_v31 = vpop.permute.xlu0 %765 }
 0x160   : > { %v810_v33 = vmul.f32 %v3352_v29, %v762_v30  ;;  %v811_v34 = vmul.f32 %v3352_v29, %v766_v31 }
 0x161   : > { %2862 = vset.pattern.permute.xlu1 %v2975_v55 }
 0x162   : > { %v3358_v35 = vadd.f32 %v810_v33, %v726_v9  ;;  %v3360_v36 = vadd.f32 %v811_v34, %v727_v32  ;;  %877 = vperm.xlu1 %2862, %v3202_v49  }
 0x163   : > { %v770_v37 = vpop.permute.xlu1 %769  ;;  %v774_v38 = vpop.permute.xlu0 %773 }
 0x164   : > { %v812_v41 = vmul.f32 %v3352_v29, %v770_v37  ;;  %v813_v42 = vmul.f32 %v3352_v29, %v774_v38  ;;  %v902_v37 = vsub.s32 2, %v3290_v63 }
 0x166   : > { %v3366_v43 = vadd.f32 %v812_v41, %v728_v12  ;;  %v3368_v44 = vadd.f32 %v813_v42, %v729_v40  ;;  %2863 = vset.pattern.permute.xlu1 %v2978_v58  ;;  %v733_v12 = vmul.f32 %v3313_v6, %v704_v16  ;;  %v1002_v40 = vsub.s32 3, %v3290_v63 }
 0x167   : > { %v778_v45 = vpop.permute.xlu1 %777  ;;  %1069 = vperm.xlu1 %2863, %v3194_v47   ;;  %v782_v54 = vpop.permute.xlu0 %781  ;;  %v720_v41 = vmul.f32 %v3313_v6, %v3285_v62  ;;  %v804_v42 = vmul.f32 %v3352_v29, %v3336_v23 }
 0x168   : > { %v814_v2 = vmul.f32 %v3352_v29, %v778_v45  ;;  %v815_v7 = vmul.f32 %v3352_v29, %v782_v54  ;;  %v1102_v54 = vsub.s32 4, %v3290_v63  ;;  %v3423_v62 = vrot.slane %v3303_v3, %v1002_v40 }
 0x16a   : > { %v3375_v8 = vadd.f32 %v814_v2, %v730_v15  ;;  %v3377_v9 = vadd.f32 %v815_v7, %v731_v59  ;;  %v721_v59 = vmul.f32 %v3313_v6, %v3295_v1  ;;  %v805_v2 = vmul.f32 %v3352_v29, %v3333_v22 }
 0x16b   : > { %v786_v10 = vpop.permute.xlu1 %785  ;;  %1073 = vperm.xlu1 %2863, %v3191_v46   ;;  %v790_v11 = vpop.permute.xlu0 %789  ;;  %v1202_v7 = vsub.s32 5, %v3290_v63 }
 0x16c   : > { %v816_v14 = vmul.f32 %v3352_v29, %v786_v10  ;;  %v817_v47 = vmul.f32 %v3352_v29, %v790_v11  ;;  %v820_v10 = vadd.f32 %v804_v42, %v720_v41 }
 0x16d   : > { %v3432_v22 = vrot.slane %v3303_v3, %v1202_v7 }
 0x16e   : > { %v3383_v17 = vadd.f32 %v816_v14, %v732_v18  ;;  %v3385_v13 = vadd.f32 %v817_v47, %v733_v12  ;;  %v3429_v12 = vrot.slane %v3303_v3, %v1102_v54  ;;  %v821_v14 = vadd.f32 %v805_v2, %v721_v59 }
 0x16f   : > { %v794_v20 = vpop.permute.xlu1 %793  ;;  %2864 = vset.pattern.permute.xlu1 %v2977_v57  ;;  %v798_v15 = vpop.permute.xlu0 %797 }
 0x170   : > { %v818_v30 = vmul.f32 %v3352_v29, %v794_v20  ;;  %v819_v31 = vmul.f32 %v3352_v29, %v798_v15  ;;  %977 = vperm.xlu1 %2864, %v3202_v49  }
 0x172   : > { %v3392_v16 = vadd.f32 %v818_v30, %v734_v21  ;;  %v3394_v32 = vadd.f32 %v819_v31, %v735_v26 }
 0x174   : > { %981 = vperm.xlu1 %2864, %v3199_v48   ;;  %v838_v18 = vpop.permute.xlu1 %837  ;;  %v1142_v33 = vpop.permute.xlu0 %1141 }
 0x175   : > { %v1205_v40 = vmul.f32 %v3432_v22, %v1142_v33 }
 0x178   : > { %2866 = vset.pattern.permute.xlu1 %v2976_v56  ;;  %v3398_v34 = vpop.permute.xlu0 %1145 }
 0x179   : > { %1173 = vperm.xlu1 %2866, %v3191_v46   ;;  %v938_v19 = vpop.permute.xlu1 %937  ;;  %v3412_v46 = vrot.slane %v3303_v3, %v902_v37 }
 0x17a   : > { %v1004_v47 = vmul.f32 %v3423_v62, %v938_v19 }
 0x17b   : > { %v904_v11 = vmul.f32 %v3412_v46, %v838_v18 }
 0x17c   : > { %v3402_v38 = vpop.permute.xlu0 %1165 }
 0x17d   : > { %2868 = vset.pattern.permute.xlu1 %v2978_v58  ;;  %v942_v21 = vpop.permute.xlu1 %941  ;;  %v920_v26 = vadd.f32 %v904_v11, %v820_v10 }
 0x17e   : > { %1077 = vperm.xlu1 %2868, %v3202_v49   ;;  %v1005_v30 = vmul.f32 %v3423_v62, %v942_v21  ;;  %v3447_v21 = vld [vmem:[%s4037_s7] ss:$0 sm:$0xff] }
 0x17f   : > { %v1020_v3 = vadd.f32 %v1004_v47, %v920_v26 }
 0x180   : > { %v3414_v45 = vpop.permute.xlu0 %1169 }
 0x182   : > { %2869 = vset.pattern.permute.xlu1 %v2975_v55  ;;  %v1038_v23 = vpop.permute.xlu1 %1037 }
 0x183   : > { %889 = vperm.xlu1 %2869, %v3207_v50   ;;  %v1104_v31 = vmul.f32 %v3429_v12, %v1038_v23 }
 0x185   : > { %v842_v1 = vpop.permute.xlu0 %841  ;;  %v1120_v54 = vadd.f32 %v1104_v31, %v1020_v3 }
 0x186   : > { %v905_v20 = vmul.f32 %v3412_v46, %v842_v1  ;;  %v1042_v15 = vpop.permute.xlu1 %1041 }
 0x187   : > { %2870 = vset.pattern.permute.xlu1 %v2977_v57  ;;  %v1105_v19 = vmul.f32 %v3429_v12, %v1042_v15 }
 0x188   : > { %v921_v18 = vadd.f32 %v905_v20, %v821_v14  ;;  %985 = vperm.xlu1 %2870, %v3210_v51  }
 0x189   : > { %v846_v37 = vpop.permute.xlu0 %845 }
 0x18a   : > { %v1021_v41 = vadd.f32 %v1005_v30, %v921_v18 }
 0x18b   : > { %v1138_v42 = vpop.permute.xlu1 %1137 }
 0x18c   : > { %v1121_v59 = vadd.f32 %v1105_v19, %v1021_v41  ;;  %v1204_v2 = vmul.f32 %v3432_v22, %v1138_v42  ;;  %2871 = vset.pattern.permute.xlu1 %v2976_v56 }
 0x18d   : > { %1177 = vperm.xlu1 %2871, %v3202_v49   ;;  %v850_v7 = vpop.permute.xlu0 %849 }
 0x18e   : > { %v1221_v33 = vadd.f32 %v1205_v40, %v1121_v59  ;;  %v1220_v23 = vadd.f32 %v1204_v2, %v1120_v54  ;;  %v807_v54 = vmul.f32 %v3352_v29, %v3341_v25  ;;  %v907_v59 = vmul.f32 %v3412_v46, %v850_v7 }
 0x190   : > { %v1244_v10 = vadd.f32 %v3447_v21, %v1221_v33  ;;  %v950_v11 = vpop.permute.xlu1 %949  ;;  %v1243_v1 = vadd.f32 %v3447_v21, %v1220_v23 }
 0x191   : > { %1181 = vperm.xlu1 %2871, %v3199_v48   ;;  %v3453_v14 = vpop.permute.xlu0 %857  ;;  %v1007_v23 = vmul.f32 %v3423_v62, %v950_v11  ;;  %v1206_v11 = vmul.f32 %v3432_v22, %v3398_v34 }
 0x192   : > { %v1260_v47 = vmax.f32 %v1244_v10, 0.0  ;;  %v1259_v20 = vmax.f32 %v1243_v1, 0.0  ;;  %v722_v10 = vmul.f32 %v3313_v6, %v3282_v61 }
 0x194   : > { %2640 = vmatprep.mubr.msk.f32.mxu0 %vm1283_vm3, %v1259_v20 }
 0x195   : > { %2872 = vset.pattern.permute.xlu1 %v2975_v55  ;;  %v854_v49 = vpop.permute.xlu1 %853  ;;  %2641 = vmatmul.mubr.msk.f32.vlgmr.msra.gmra.mrb[0].mxu0 %vm1283_vm3, %v1260_v47  ;;  %v3458_v15 = vpop.permute.xlu0 %861 }
 0x196   : > { %893 = vperm.xlu1 %2872, %v3218_v53   ;;  %v908_v34 = vmul.f32 %v3412_v46, %v854_v49 }
 0x199   : > { %v882_v26 = vpop.permute.xlu0 %881 }
 0x19a   : > { %v915_v30 = vmul.f32 %v3412_v46, %v882_v26  ;;  %897 = vperm.xlu1 %2872, %v3215_v52   ;;  %v1046_v48 = vpop.permute.xlu1 %1045 }
 0x19b   : > { %v1106_v61 = vmul.f32 %v3429_v12, %v1046_v48  ;;  %v725_v48 = vmul.f32 %v3313_v6, %v3305_v4 }
 0x19c   : > { %v3464_v31 = vadd.f32 %v915_v30, %v3377_v9 }
 0x19d   : > { %v886_v18 = vpop.permute.xlu0 %885 }
 0x19e   : > { %v916_v40 = vmul.f32 %v3412_v46, %v886_v18  ;;  %2874 = vset.pattern.permute.xlu1 %v2978_v58  ;;  %v1050_v55 = vpop.permute.xlu1 %1049 }
 0x19f   : > { %1089 = vperm.xlu1 %2874, %v3207_v50   ;;  %v1107_v7 = vmul.f32 %v3429_v12, %v1050_v55  ;;  %v808_v55 = vmul.f32 %v3352_v29, %v3345_v27 }
 0x1a0   : > { %v3470_v3 = vadd.f32 %v916_v40, %v3383_v17  ;;  %v723_v17 = vmul.f32 %v3313_v6, %v3292_v0  ;;  %v906_v0 = vmul.f32 %v3412_v46, %v846_v37  ;;  %v724_v40 = vmul.f32 %v3313_v6, %v3307_v5 }
 0x1a1   : > { %v909_v5 = vmul.f32 %v3412_v46, %v3453_v14 }
 0x1a2   : > { %v3472_v41 = vpop.permute.xlu0 %1057  ;;  %v823_v33 = vadd.f32 %v807_v54, %v723_v17 }
 0x1a3   : > { %2875 = vset.pattern.permute.xlu1 %v2976_v56  ;;  %v954_v19 = vpop.permute.xlu1 %953 }
 0x1a4   : > { %1185 = vperm.xlu1 %2875, %v3210_v51   ;;  %v806_v51 = vmul.f32 %v3352_v29, %v3338_v24  ;;  %v923_v25 = vadd.f32 %v907_v59, %v823_v33  ;;  %v809_v59 = vmul.f32 %v3352_v29, %v3347_v28  ;;  %v1008_v27 = vmul.f32 %v3423_v62, %v954_v19  ;;  %v1478_v19 = vld [vmem:[%s3110_s18 + $0x8] sm:$0xff] }
 0x1a6   : > { %v3476_v9 = vpop.permute.xlu0 %1061  ;;  %v822_v47 = vadd.f32 %v806_v51, %v722_v10  ;;  %v825_v29 = vadd.f32 %v809_v59, %v725_v48  ;;  %v1477_v10 = vld [vmem:[%s3110_s18] sm:$0xff] }
 0x1a7   : > { %v958_v42 = vpop.permute.xlu1 %957  ;;  %1497 = vperm.xlu0 %2880, %v1477_v10  }
 0x1a8   : > { %2876 = vset.pattern.permute.xlu1 %v2977_v57  ;;  %v922_v20 = vadd.f32 %v906_v0, %v822_v47  ;;  %v1009_v4 = vmul.f32 %v3423_v62, %v958_v42  ;;  %v1109_v0 = vmul.f32 %v3429_v12, %v3472_v41  ;;  %v1479_v47 = vld [vmem:[%s3110_s18 + $0x10] sm:$0xff] }
 0x1a9   : > { %997 = vperm.xlu1 %2876, %v3215_v52  }
 0x1aa   : > { %v3482_v50 = vpop.permute.xlu0 %1081 }
 0x1ac   : > { %v1150_v2 = vpop.permute.xlu1 %1149 }
 0x1ad   : > { %2878 = vset.pattern.permute.xlu1 %v2978_v58  ;;  %v1023_v58 = vadd.f32 %v1007_v23, %v923_v25  ;;  %v1207_v24 = vmul.f32 %v3432_v22, %v1150_v2  ;;  %v824_v2 = vadd.f32 %v808_v55, %v724_v40  ;;  %v925_v25 = vadd.f32 %v909_v5, %v825_v29 }
 0x1ae   : > { %1093 = vperm.xlu1 %2878, %v3218_v53   ;;  %v3491_v57 = vpop.permute.xlu0 %1085 }
 0x1af   : > { %v1123_v30 = vadd.f32 %v1107_v7, %v1023_v58  ;;  %v924_v49 = vadd.f32 %v908_v34, %v824_v2  ;;  %v1025_v42 = vadd.f32 %v1009_v4, %v925_v25  ;;  %v1480_v58 = vld [vmem:[%s3110_s18 + $0x18] sm:$0xff]  ;;  %v910_v2 = vmul.f32 %v3412_v46, %v3458_v15 }
 0x1b0   : > { %1506 = vperm.xlu0 %2880, %v1480_v58  }
 0x1b1   : > { %v1054_v1 = vpop.permute.xlu1 %1053  ;;  %v1223_v54 = vadd.f32 %v1207_v24, %v1123_v30  ;;  %v1024_v14 = vadd.f32 %v1008_v27, %v924_v49  ;;  %v1481_v30 = vld [vmem:[%s3110_s18 + $0x20] sm:$0xff] }
 0x1b2   : > { %1097 = vperm.xlu1 %2878, %v3215_v52   ;;  %v1108_v6 = vmul.f32 %v3429_v12, %v1054_v1 }
 0x1b3   : > { %v946_v53 = vpop.permute.xlu0 %945 }
 0x1b4   : > { %v1006_v26 = vmul.f32 %v3423_v62, %v946_v53  ;;  %v1124_v7 = vadd.f32 %v1108_v6, %v1024_v14  ;;  %v1110_v6 = vmul.f32 %v3429_v12, %v3476_v9 }
 0x1b6   : > { %v1022_v37 = vadd.f32 %v1006_v26, %v922_v20  ;;  %2879 = vset.pattern.permute.xlu1 %v2976_v56  ;;  %v866_v18 = vpop.permute.xlu1 %865  ;;  %v1125_v20 = vadd.f32 %v1109_v0, %v1025_v42 }
 0x1b7   : > { %1197 = vperm.xlu1 %2879, %v3215_v52   ;;  %v1246_v52 = vadd.f32 %v3447_v21, %v1223_v54  ;;  %v1483_v54 = vld [vmem:[%s3110_s18 + $0x30] sm:$0xff]  ;;  %v911_v59 = vmul.f32 %v3412_v46, %v866_v18  ;;  %v966_v48 = vpop.permute.xlu0 %965  ;;  %v1211_v18 = vmul.f32 %v3432_v22, %v3402_v38 }
 0x1b8   : > { %v1122_v17 = vadd.f32 %v1106_v61, %v1022_v37  ;;  %v1011_v27 = vmul.f32 %v3423_v62, %v966_v48  ;;  %v1115_v48 = vmul.f32 %v3429_v12, %v3482_v50 }
 0x1b9   : > { %v1262_v23 = vmax.f32 %v1246_v52, 0.0  ;;  %v927_v5 = vadd.f32 %v911_v59, %v3360_v36 }
 0x1ba   : > { %v1222_v56 = vadd.f32 %v1206_v11, %v1122_v17  ;;  %v1482_v11 = vld [vmem:[%s3110_s18 + $0x28] sm:$0xff]  ;;  %v1484_v17 = vld [vmem:[%s3110_s18 + $0x38] sm:$0xff] }
 0x1bb   : > { %v962_v33 = vpop.permute.xlu1 %961  ;;  %2881 = vset.pattern.permute.xlu1 %v2973_v39  ;;  %1512 = vperm.xlu0 %2880, %v1482_v11   ;;  %v1027_v49 = vadd.f32 %v1011_v27, %v927_v5  ;;  %v970_v9 = vpop.permute.xlu0 %969  ;;  %v1491_v5 = vld [vmem:[%s3110_s18 + $0x70] sm:$0xff]  ;;  %v1492_v27 = vld [vmem:[%s3110_s18 + $0x78] sm:$0xff] }
 0x1bc   : > { %v1245_v28 = vadd.f32 %v3447_v21, %v1222_v56  ;;  %1500 = vperm.xlu1 %2881, %v1478_v19   ;;  %v1010_v52 = vmul.f32 %v3423_v62, %v962_v33 }
 0x1be   : > { %v1261_v51 = vmax.f32 %v1245_v28, 0.0  ;;  %v926_v28 = vadd.f32 %v910_v2, %v3358_v35 }
 0x1bf   : > { %1518 = vperm.xlu0 %2880, %v1484_v17  }
 0x1c0   : > { %v1154_v39 = vpop.permute.xlu1 %1153  ;;  %2643 = vmatprep.mubr.msk.f32.mxu0 %vm1283_vm3, %v1261_v51  ;;  %1503 = vperm.xlu1 %2881, %v1479_v47   ;;  %v1026_v51 = vadd.f32 %v1010_v52, %v926_v28 }
 0x1c1   : > { %v1208_v1 = vmul.f32 %v3432_v22, %v1154_v39  ;;  %2644 = vmatmul.mubr.msk.f32.gmra.mrb[2].mxu0 %vm1283_vm3, %v1262_v23 }
 0x1c2   : > { %v1126_v14 = vadd.f32 %v1110_v6, %v1026_v51 }
 0x1c3   : > { %v1224_v24 = vadd.f32 %v1208_v1, %v1124_v7  ;;  %v1012_v1 = vmul.f32 %v3423_v62, %v970_v9 }
 0x1c4   : > { %v1158_v53 = vpop.permute.xlu1 %1157  ;;  %1509 = vperm.xlu1 %2881, %v1481_v30   ;;  %v1486_v30 = vld [vmem:[%s3110_s18 + $0x48] sm:$0xff] }
 0x1c5   : > { %v1247_v41 = vadd.f32 %v3447_v21, %v1224_v24  ;;  %v1209_v26 = vmul.f32 %v3432_v22, %v1158_v53  ;;  %v1212_v53 = vmul.f32 %v3432_v22, %v3414_v45  ;;  %1524 = vperm.xlu0 %2880, %v1486_v30   ;;  %v1490_v45 = vld [vmem:[%s3110_s18 + $0x68] sm:$0xff] }
 0x1c7   : > { %v1263_v61 = vmax.f32 %v1247_v41, 0.0  ;;  %v1225_v37 = vadd.f32 %v1209_v26, %v1125_v20  ;;  %v1485_v26 = vld [vmem:[%s3110_s18 + $0x40] sm:$0xff] }
 0x1c8   : > { %1515 = vperm.xlu1 %2881, %v1483_v54   ;;  %v1489_v54 = vld [vmem:[%s3110_s18 + $0x60] sm:$0xff] }
 0x1c9   : > { %v1248_v40 = vadd.f32 %v3447_v21, %v1225_v37  ;;  %v870_v55 = vpop.permute.xlu1 %869  ;;  %2646 = vmatprep.mubr.msk.f32.mxu0 %vm1283_vm3, %v1263_v61  ;;  %v1487_v61 = vld [vmem:[%s3110_s18 + $0x50] sm:$0xff] }
 0x1ca   : > { %v912_v0 = vmul.f32 %v3412_v46, %v870_v55 }
 0x1cb   : > { %v1264_v34 = vmax.f32 %v1248_v40, 0.0 }
 0x1cc   : > { %v928_v7 = vadd.f32 %v912_v0, %v3366_v43  ;;  %1521 = vperm.xlu1 %2881, %v1485_v26   ;;  %v1488_v43 = vld [vmem:[%s3110_s18 + $0x58] sm:$0xff] }
 0x1cd   : > { %v874_v56 = vpop.permute.xlu1 %873  ;;  %2647 = vmatmul.mubr.msk.f32.gmra.mrb[4].mxu0 %vm1283_vm3, %v1264_v34  ;;  %1530 = vperm.xlu0 %2880, %v1488_v43  }
 0x1ce   : > { %v1028_v58 = vadd.f32 %v1012_v1, %v928_v7  ;;  %v913_v17 = vmul.f32 %v3412_v46, %v874_v56 }
 0x1d0   : > { %1527 = vperm.xlu1 %2881, %v1487_v61   ;;  %v929_v52 = vadd.f32 %v913_v17, %v3368_v44 }
 0x1d1   : > { %1536 = vperm.xlu0 %2880, %v1490_v45  }
 0x1d2   : > { %v1066_v29 = vpop.permute.xlu1 %1065 }
 0x1d3   : > { %v1111_v4 = vmul.f32 %v3429_v12, %v1066_v29 }
 0x1d4   : > { %1533 = vperm.xlu1 %2881, %v1489_v54  }
 0x1d5   : > { %v1127_v15 = vadd.f32 %v1111_v4, %v1027_v49  ;;  %1542 = vperm.xlu0 %2880, %v1492_v27  }
 0x1d7   : > { %v1227_v25 = vadd.f32 %v1211_v18, %v1127_v15  ;;  %v1162_v36 = vpop.permute.xlu1 %1161 }
 0x1d8   : > { %v1210_v23 = vmul.f32 %v3432_v22, %v1162_v36  ;;  %1539 = vperm.xlu1 %2881, %v1491_v5  }
 0x1d9   : > { %v1250_v35 = vadd.f32 %v3447_v21, %v1227_v25 }
 0x1da   : > { %v1226_v33 = vadd.f32 %v1210_v23, %v1126_v14  ;;  %v1116_v23 = vmul.f32 %v3429_v12, %v3491_v57 }
 0x1db   : > { %v1266_v39 = vmax.f32 %v1250_v35, 0.0 }
 0x1dc   : > { %v1249_v19 = vadd.f32 %v3447_v21, %v1226_v33  ;;  %v974_v10 = vpop.permute.xlu1 %973 }
 0x1dd   : > { %v1013_v59 = vmul.f32 %v3423_v62, %v974_v10 }
 0x1de   : > { %v1265_v38 = vmax.f32 %v1249_v19, 0.0 }
 0x1df   : > { %v1029_v29 = vadd.f32 %v1013_v59, %v929_v52 }
 0x1e0   : > { %2649 = vmatprep.mubr.msk.f32.mxu0 %vm1283_vm3, %v1265_v38 }
 0x1e1   : > { %v878_v42 = vpop.permute.xlu1 %877  ;;  %2650 = vmatmul.mubr.msk.f32.gmra.mrb[6].mxu0 %vm1283_vm3, %v1266_v39 }
 0x1e2   : > { %v914_v36 = vmul.f32 %v3412_v46, %v878_v42 }
 0x1e4   : > { %v930_v35 = vadd.f32 %v914_v36, %v3375_v8 }
 0x1e6   : > { %v1070_v47 = vpop.permute.xlu1 %1069 }
 0x1e7   : > { %v1112_v24 = vmul.f32 %v3429_v12, %v1070_v47 }
 0x1e9   : > { %v1128_v41 = vadd.f32 %v1112_v24, %v1028_v58 }
 0x1ea   : > { %v1074_v20 = vpop.permute.xlu1 %1073 }
 0x1eb   : > { %v1228_v11 = vadd.f32 %v1212_v53, %v1128_v41  ;;  %v1113_v28 = vmul.f32 %v3429_v12, %v1074_v20  ;;  %v990_v53 = vpop.permute.xlu0 %989 }
 0x1ec   : > { %v1017_v61 = vmul.f32 %v3423_v62, %v990_v53 }
 0x1ed   : > { %v1251_v37 = vadd.f32 %v3447_v21, %v1228_v11  ;;  %v1129_v4 = vadd.f32 %v1113_v28, %v1029_v29 }
 0x1ef   : > { %v1267_v40 = vmax.f32 %v1251_v37, 0.0  ;;  %v978_v55 = vpop.permute.xlu1 %977  ;;  %v994_v26 = vpop.permute.xlu0 %993 }
 0x1f0   : > { %v1018_v28 = vmul.f32 %v3423_v62, %v994_v26 }
 0x1f1   : > { %2652 = vmatprep.mubr.msk.f32.mxu0 %vm1283_vm3, %v1267_v40 }
 0x1f3   : > { %v982_v34 = vpop.permute.xlu1 %981  ;;  %v1190_v43 = vpop.permute.xlu0 %1189 }
 0x1f4   : > { %v1015_v2 = vmul.f32 %v3423_v62, %v982_v34  ;;  %v1217_v54 = vmul.f32 %v3432_v22, %v1190_v43  ;;  %v3708_v43 = vadd.s32 24, %v3290_v63 }
 0x1f6   : > { %v1031_v56 = vadd.f32 %v1015_v2, %v3464_v31  ;;  %v1014_v31 = vmul.f32 %v3423_v62, %v978_v55 }
 0x1f8   : > { %v1174_v18 = vpop.permute.xlu1 %1173  ;;  %v1131_v49 = vadd.f32 %v1115_v48, %v1031_v56  ;;  %v1030_v38 = vadd.f32 %v1014_v31, %v930_v35 }
 0x1f9   : > { %v1213_v6 = vmul.f32 %v3432_v22, %v1174_v18  ;;  %v1194_v18 = vpop.permute.xlu0 %1193 }
 0x1fb   : > { %v1229_v51 = vadd.f32 %v1213_v6, %v1129_v4 }
 0x1fd   : > { %v1252_v50 = vadd.f32 %v3447_v21, %v1229_v51  ;;  %v1078_v15 = vpop.permute.xlu1 %1077  ;;  %v1218_v51 = vmul.f32 %v3432_v22, %v1194_v18 }
 0x1fe   : > { %v1114_v19 = vmul.f32 %v3429_v12, %v1078_v15 }
 0x1ff   : > { %v1268_v25 = vmax.f32 %v1252_v50, 0.0 }
 0x200   : > { %v1130_v9 = vadd.f32 %v1114_v19, %v1030_v38 }
 0x201   : > { %2653 = vmatmul.mubr.msk.f32.gmra.mrb[8].mxu0 %vm1283_vm3, %v1268_v25 }
 0x202   : > { %v890_v44 = vpop.permute.xlu1 %889 }
 0x207   : > { %v986_v14 = vpop.permute.xlu1 %985 }
 0x208   : > { %v1016_v33 = vmul.f32 %v3423_v62, %v986_v14 }
 0x20a   : > { %v1032_v10 = vadd.f32 %v1016_v33, %v3470_v3  ;;  %v917_v3 = vmul.f32 %v3412_v46, %v890_v44 }
 0x20c   : > { %v1178_v0 = vpop.permute.xlu1 %1177  ;;  %v1132_v39 = vadd.f32 %v1116_v23, %v1032_v10  ;;  %v933_v11 = vadd.f32 %v917_v3, %v3385_v13 }
 0x20d   : > { %v1214_v42 = vmul.f32 %v3432_v22, %v1178_v0 }
 0x20e   : > { %v1033_v40 = vadd.f32 %v1017_v61, %v933_v11  ;;  %v3702_v11 = vadd.s32 8, %v3290_v63  ;;  %v3705_v61 = vadd.s32 16, %v3290_v63 }
 0x20f   : > { %v1230_v7 = vadd.f32 %v1214_v42, %v1130_v9 }
 0x210   : > { %v1182_v1 = vpop.permute.xlu1 %1181 }
 0x211   : > { %v1253_v47 = vadd.f32 %v3447_v21, %v1230_v7  ;;  %v1215_v57 = vmul.f32 %v3432_v22, %v1182_v1  ;;  %v3661_v7 = vld [vmem:[%s4039_s9] ss:$0 sm:$0xff] }
 0x213   : > { %v1269_v58 = vmax.f32 %v1253_v47, 0.0  ;;  %v1231_v24 = vadd.f32 %v1215_v57, %v1131_v49 }
 0x215   : > { %v1254_v8 = vadd.f32 %v3447_v21, %v1231_v24  ;;  %v894_v41 = vpop.permute.xlu1 %893  ;;  %2655 = vmatprep.mubr.msk.f32.mxu0 %vm1283_vm3, %v1269_v58 }
 0x216   : > { %v918_v48 = vmul.f32 %v3412_v46, %v894_v41 }
 0x217   : > { %v1270_v20 = vmax.f32 %v1254_v8, 0.0 }
 0x218   : > { %v934_v52 = vadd.f32 %v918_v48, %v3392_v16 }
 0x219   : > { %v898_v30 = vpop.permute.xlu1 %897  ;;  %2656 = vmatmul.mubr.msk.f32.gmra.mrb[10].mxu0 %vm1283_vm3, %v1270_v20 }
 0x21a   : > { %v1034_v4 = vadd.f32 %v1018_v28, %v934_v52  ;;  %v919_v50 = vmul.f32 %v3412_v46, %v898_v30 }
 0x21c   : > { %v935_v36 = vadd.f32 %v919_v50, %v3394_v32  ;;  %v3624_v32 = vand.u32 127, %v716_v60 }
 0x21e   : > { %v1090_v37 = vpop.permute.xlu1 %1089 }
 0x21f   : > { %v1117_v55 = vmul.f32 %v3429_v12, %v1090_v37  ;;  %v3711_v37 = vadd.s32 32, %v3290_v63 }
 0x221   : > { %v1133_v45 = vadd.f32 %v1117_v55, %v1033_v40  ;;  %v3718_v40 = vld [vmem:[%s497_s25] ss:$0 sm:$0xff]  ;;  %v3721_v55 = vadd.s32 40, %v3290_v63 }
 0x222   : > { %vm1574_vm2 = vcmp.eq.s32.totalorder %v3702_v11, %v3718_v40  ;;  %vm1575_vm1 = vcmp.eq.s32.totalorder %v3705_v61, %v3718_v40  ;;  %vm4048_vm0 = vcmp.eq.s32.totalorder %v3708_v43, %v3718_v40  ;;  %vm1577_vm15 = vcmp.eq.s32.totalorder %v3711_v37, %v3718_v40 }
 0x223   : > { %v1233_v17 = vadd.f32 %v1217_v54, %v1133_v45  ;;  %v1186_v59 = vpop.permute.xlu1 %1185  ;;  %v3724_v54 = vadd.s32 48, %v3290_v63  ;;  %v3727_v45 = vadd.s32 56, %v3290_v63  ;;  %vm1578_vm14 = vcmp.eq.s32.totalorder %v3721_v55, %v3718_v40 }
 0x224   : > { %v1216_v34 = vmul.f32 %v3432_v22, %v1186_v59 }
 0x225   : > { %v1256_v5 = vadd.f32 %v3447_v21, %v1233_v17  ;;  %vm1579_vm13 = vcmp.eq.s32.totalorder %v3724_v54, %v3718_v40  ;;  %vm4049_vm12 = vcmp.eq.s32.totalorder %v3727_v45, %v3718_v40 }
 0x226   : > { %v1232_v2 = vadd.f32 %v1216_v34, %v1132_v39  ;;  %v3628_v0 = vpop.permute.xlu0 %1497 }
 0x227   : > { %v1272_v29 = vmax.f32 %v1256_v5, 0.0  ;;  %vm1544_vm5 = vcmp.eq.s32.totalorder %v3624_v32, %v3628_v0 }
 0x228   : > { %v1255_v13 = vadd.f32 %v3447_v21, %v1232_v2  ;;  %v998_v27 = vpop.permute.xlu1 %997 }
 0x229   : > { %v1019_v16 = vmul.f32 %v3423_v62, %v998_v27 }
 0x22a   : > { %v1271_v56 = vmax.f32 %v1255_v13, 0.0 }
 0x22b   : > { %v1035_v23 = vadd.f32 %v1019_v16, %v935_v36 }
 0x22c   : > { %2658 = vmatprep.mubr.msk.f32.mxu0 %vm1283_vm3, %v1271_v56 }
 0x22d   : > { %v1094_v49 = vpop.permute.xlu1 %1093  ;;  %2659 = vmatmul.mubr.msk.f32.gmra.mrb[12].mxu0 %vm1283_vm3, %v1272_v29 }
 0x22e   : > { %v1118_v6 = vmul.f32 %v3429_v12, %v1094_v49 }
 0x22f   : > { %v3636_v39 = vpop.permute.xlu0 %1506 }
 0x230   : > { %v1134_v15 = vadd.f32 %v1118_v6, %v1034_v4  ;;  %vm1547_vm7 = vcmp.eq.s32.totalorder %v3624_v32, %v3636_v39 }
 0x231   : > { %v1098_v25 = vpop.permute.xlu1 %1097 }
 0x232   : > { %v1234_v44 = vadd.f32 %v1218_v51, %v1134_v15  ;;  %v1119_v31 = vmul.f32 %v3429_v12, %v1098_v25 }
 0x234   : > { %v1257_v14 = vadd.f32 %v3447_v21, %v1234_v44  ;;  %v1135_v19 = vadd.f32 %v1119_v31, %v1035_v23 }
 0x236   : > { %v1273_v33 = vmax.f32 %v1257_v14, 0.0  ;;  %v1198_v35 = vpop.permute.xlu1 %1197 }
 0x237   : > { %v1219_v10 = vmul.f32 %v3432_v22, %v1198_v35 }
 0x238   : > { %2661 = vmatprep.mubr.msk.f32.mxu0 %vm1283_vm3, %v1273_v33 }
 0x239   : > { %v1235_v46 = vadd.f32 %v1219_v10, %v1135_v19  ;;  %v2979_v19 = vmov (!%p2501_p11), 0.0  }
 0x23a   : > { %v2504_v10 = vsel (!%p2501_p11), %vm1575_vm1, 1.0, %v2979_v19 }
 0x23b   : > { %v1258_v38 = vadd.f32 %v3447_v21, %v1235_v46  ;;  %v3626_v12 = vpop.permute.xlu1 %1500  ;;  %v3644_v21 = vpop.permute.xlu0 %1512  ;;  %1612 = vadd.xlane.f32.xlu1 (!%p2501_p11), %v2504_v10 }
 0x23c   : > { %vm1545_vm4 = vcmp.eq.s32.totalorder %v3624_v32, %v3626_v12  ;;  %vm1549_vm9 = vcmp.eq.s32.totalorder %v3624_v32, %v3644_v21 }
 0x23d   : > { %v1274_v62 = vmax.f32 %v1258_v38, 0.0  ;;  %v2505_v38 = vsel (!%p2501_p11), %vm4048_vm0, 1.0, %v2979_v19  ;;  %vm1632_vm0 = vcmask (!%p2501_p11), 7168  }
 0x23f   : > { %2662 = vmatmul.mubr.msk.f32.gmra.mrb[14].mxu0 %vm1283_vm3, %v1274_v62  ;;  %v3634_v22 = vpop.permute.xlu1 %1503  ;;  %v3652_v42 = vpop.permute.xlu0 %1518  ;;  %vm1573_vm3 = vcmp.eq.s32.totalorder %v3290_v63, %v3718_v40  ;;  %v2503_v62 = vsel (!%p2501_p11), %vm1574_vm2, 1.0, %v2979_v19  ;;  %1614 = vadd.xlane.f32.xlu1 (!%p2501_p11), %v2505_v38 }
 0x240   : > { %vm1546_vm6 = vcmp.eq.s32.totalorder %v3624_v32, %v3634_v22  ;;  %vm1551_vm11 = vcmp.eq.s32.totalorder %v3624_v32, %v3652_v42  ;;  %v2502_v46 = vsel (!%p2501_p11), %vm1573_vm3, 1.0, %v2979_v19 }
 0x241   : > { %1608 = vadd.xlane.f32.xlu0 (!%p2501_p11), %v2502_v46 }
 0x243   : > { %v3642_v60 = vpop.permute.xlu1 %1509 }
 0x244   : > { %vm1548_vm8 = vcmp.eq.s32.totalorder %v3624_v32, %v3642_v60  ;;  %v3671_v53 = vpop.permute.xlu0 %1524 }
 0x245   : > { %1610 = vadd.xlane.f32.xlu0 (!%p2501_p11), %v2503_v62 }
 0x247   : > { %v3650_v9 = vpop.permute.xlu1 %1515 }
 0x248   : > { %vm1550_vm10 = vcmp.eq.s32.totalorder %v3624_v32, %v3650_v9 }
 0x24b   : > { %v3669_v24 = vpop.permute.xlu1 %1521 }
 0x24c   : > { %v3679_v41 = vpop.permute.xlu0 %1530 }
 0x24f   : > { %v3677_v8 = vpop.permute.xlu1 %1527 }
 0x250   : > { %v3687_v20 = vpop.permute.xlu0 %1536 }
 0x253   : > { %v3685_v3 = vpop.permute.xlu1 %1533 }
 0x254   : > { %v3695_v30 = vpop.permute.xlu0 %1542 }
 0x257   : > { %v3693_v26 = vpop.permute.xlu1 %1539 }
 0x268   : > { %v2642_v1 = vpop.f32.mrb[0].mxu0 }
 0x269   : > { %v3664_v47 = vadd.f32 %v2642_v1, %v3661_v7  ;;  %v1398_v57 = vpop.f32.mrb[1].mxu0  ;;  %v2506_v1 = vsel (!%p2501_p11), %vm1577_vm15, 1.0, %v2979_v19 }
 0x26a   : > { %v3667_v58 = vadd.f32 %v3661_v7, %v1398_v57  ;;  %1616 = vadd.xlane.f32.xlu0 (!%p2501_p11), %v2506_v1  ;;  %v2509_v57 = vsel (!%p2501_p11), %vm4049_vm12, 1.0, %v2979_v19  ;;  %v1590_v1 = vld [vmem:[#allocation4 + $0x30] sm:$0xff] (!%p2501_p11) }
 0x294   : > { %v2645_v17 = vpop.f32.mrb[2].mxu0 }
 0x295   : > { %v3738_v59 = vadd.f32 %v2645_v17, %v3661_v7  ;;  %v1408_v34 = vpop.f32.mrb[3].mxu0  ;;  %v2508_v17 = vsel (!%p2501_p11), %vm1579_vm13, 1.0, %v2979_v19 }
 0x296   : > { %v3747_v48 = vadd.f32 %v3661_v7, %v1408_v34  ;;  %1620 = vadd.xlane.f32.xlu0 (!%p2501_p11), %v2508_v17  ;;  %v1586_v34 = vld [vmem:[#allocation4 + $0x10] sm:$0xff] (!%p2501_p11) }
 0x2a0   : > { %v2648_v2 = vpop.f32.mrb[4].mxu0 }
 0x2a1   : > { %v3752_v5 = vadd.f32 %v2648_v2, %v3661_v7  ;;  %v1418_v13 = vpop.f32.mrb[5].mxu0  ;;  %v1584_v2 = vld [vmem:[#allocation4] sm:$0xff] (!%p2501_p11) }
 0x2a2   : > { %v3755_v27 = vadd.f32 %v3661_v7, %v1418_v13 }
 0x2b4   : > { %v2651_v52 = vpop.f32.mrb[6].mxu0 }
 0x2b5   : > { %v3758_v28 = vadd.f32 %v2651_v52, %v3661_v7  ;;  %v1428_v56 = vpop.f32.mrb[7].mxu0 }
 0x2b6   : > { %v3761_v29 = vadd.f32 %v3661_v7, %v1428_v56 }
 0x2c8   : > { %v1613_v13 = vpop.xlane.xlu1 (!%p2501_p11), %1612 }
 0x2c9   : > { %v1626_v56 = vadd.f32 (!%p2501_p11), %v1613_v13, %v1586_v34 }
 0x2cb   : > { %1635 = vst.msk [vmem:[#allocation4 + $0x10] sm:$0xff] (!%p2501_p11), %vm1632_vm0, %v1626_v56 }
 0x2ce   : > { %v1609_v52 = vpop.xlane.xlu0 (!%p2501_p11), %1608 }
 0x2d4   : > { %v2654_v18 = vpop.f32.mrb[8].mxu0 }
 0x2d5   : > { %v3764_v49 = vadd.f32 %v2654_v18, %v3661_v7  ;;  %v1438_v4 = vpop.f32.mrb[9].mxu0  ;;  %v1624_v18 = vadd.f32 (!%p2501_p11), %v1609_v52, %v1584_v2 }
 0x2d6   : > { %v3767_v6 = vadd.f32 %v3661_v7, %v1438_v4  ;;  %v1587_v4 = vld [vmem:[#allocation4 + $0x18] sm:$0xff] (!%p2501_p11) }
 0x2d7   : > { %1633 = vst.msk [vmem:[#allocation4] sm:$0xff] (!%p2501_p11), %vm1632_vm0, %v1624_v18 }
 0x2ec   : > { %v2657_v51 = vpop.f32.mrb[10].mxu0 }
 0x2ed   : > { %v3770_v50 = vadd.f32 %v2657_v51, %v3661_v7  ;;  %v1448_v15 = vpop.f32.mrb[11].mxu0  ;;  %v1585_v51 = vld [vmem:[#allocation4 + $0x8] sm:$0xff] (!%p2501_p11) }
 0x2ee   : > { %v3773_v16 = vadd.f32 %v3661_v7, %v1448_v15  ;;  %v1615_v15 = vpop.xlane.xlu1 (!%p2501_p11), %1614 }
 0x300   : > { %v2660_v25 = vpop.f32.mrb[12].mxu0 }
 0x301   : > { %v3776_v44 = vadd.f32 %v2660_v25, %v3661_v7  ;;  %v1458_v36 = vpop.f32.mrb[13].mxu0  ;;  %v1611_v25 = vpop.xlane.xlu0 (!%p2501_p11), %1610 }
 0x302   : > { %v3779_v31 = vadd.f32 %v3661_v7, %v1458_v36  ;;  %v1627_v36 = vadd.f32 (!%p2501_p11), %v1615_v15, %v1587_v4 }
 0x304   : > { %1636 = vst.msk [vmem:[#allocation4 + $0x18] sm:$0xff] (!%p2501_p11), %vm1632_vm0, %v1627_v36 }
 0x305   : > { %v1617_v46 = vpop.xlane.xlu0 (!%p2501_p11), %1616 }
 0x30e   : > { %1583 = sbr.rel (%p2501_p11) target bundleno = 938 (0x3aa), region = 88 }
 0x312   : > { %v2663_v14 = vpop.f32.mrb[14].mxu0 }
 0x313   : > { %v3782_v23 = vadd.f32 %v2663_v14, %v3661_v7  ;;  %v1468_v33 = vpop.f32.mrb[15].mxu0  ;;  %v1625_v14 = vadd.f32 (!%p2501_p11), %v1611_v25, %v1585_v51 }
 0x314   : > { %v3785_v35 = vadd.f32 %v3661_v7, %v1468_v33  ;;  %v2507_v7 = vsel (!%p2501_p11), %vm1578_vm14, 1.0, %v2979_v19  ;;  %v1589_v33 = vld [vmem:[#allocation4 + $0x28] sm:$0xff] (!%p2501_p11)  ;;  %v1588_v19 = vld [vmem:[#allocation4 + $0x20] sm:$0xff] (!%p2501_p11) }
 0x315   : > { %1618 = vadd.xlane.f32.xlu1 %v2507_v7  ;;  %1634 = vst.msk [vmem:[#allocation4 + $0x8] sm:$0xff] %vm1632_vm0, %v1625_v14  ;;  %v1628_v62 = vadd.f32 %v1617_v46, %v1588_v19  ;;  %v1591_v7 = vld [vmem:[#allocation4 + $0x38] sm:$0xff] }
 0x317   : > { %1637 = vst.msk [vmem:[#allocation4 + $0x20] sm:$0xff] %vm1632_vm0, %v1628_v62 }
 0x319   : > { %1622 = vadd.xlane.f32.xlu1 %v2509_v57 }
 0x323   : > { %v1621_v17 = vpop.xlane.xlu0 %1620 }
 0x324   : > { %v1630_v2 = vadd.f32 %v1621_v17, %v1590_v1 }
 0x326   : > { %1639 = vst.msk [vmem:[#allocation4 + $0x30] sm:$0xff] %vm1632_vm0, %v1630_v2 }
 0x3a2   : > { %v1619_v10 = vpop.xlane.xlu1 %1618 }
 0x3a3   : > { %v1629_v38 = vadd.f32 %v1619_v10, %v1589_v33 }
 0x3a5   : > { %1638 = vst.msk [vmem:[#allocation4 + $0x28] sm:$0xff] %vm1632_vm0, %v1629_v38 }
 0x3a6   : > { %v1623_v57 = vpop.xlane.xlu1 %1622 }
 0x3a7   : > { %v1631_v34 = vadd.f32 %v1623_v57, %v1591_v7 }
 0x3a9   : > { %1640 = vst.msk [vmem:[#allocation4 + $0x38] sm:$0xff] %vm1632_vm0, %v1631_v34 }
 0x3aa PF: > { %v1641_v13 = vld [vmem:[#allocation2] sm:$0xff]  ;;  %v1642_v52 = vld [vmem:[#allocation2 + $0x8] sm:$0xff]  ;;  %v1643_v56 = vld [vmem:[#allocation2 + $0x10] sm:$0xff]  ;;  %v2980_v51 = vmov 0.0   ;;  %vm1693_vm12 = vcmask 523264   ;;  %p1949_p12 = scmp.eq.s32.totalorder %s2952_s29, 1 }
 0x3ab   : > { %v1649_v18 = vpack.c.bf16 %v1642_v52, %v1641_v13  ;;  %v1644_v4 = vld [vmem:[#allocation2 + $0x18] sm:$0xff]  ;;  %v2510_v15 = vsel %vm1544_vm5, 1.0, %v2980_v51  ;;  %v2511_v25 = vsel %vm1545_vm4, 1.0, %v2980_v51  ;;  %v1645_v14 = vld [vmem:[#allocation2 + $0x20] sm:$0xff]  ;;  %v1646_v33 = vld [vmem:[#allocation2 + $0x28] sm:$0xff]  ;;  %v2512_v12 = vsel %vm1546_vm6, 1.0, %v2980_v51 }
 0x3ac   : > { %v1650_v36 = vpack.c.bf16 %v1644_v4, %v1643_v56  ;;  %v1685_v19 = vpack.c.bf16 %v2511_v25, %v2510_v15  ;;  %v1651_v10 = vpack.c.bf16 %v1646_v33, %v1645_v14  ;;  %v1647_v46 = vld [vmem:[#allocation2 + $0x30] sm:$0xff]  ;;  %v1648_v38 = vld [vmem:[#allocation2 + $0x38] sm:$0xff]  ;;  %v2513_v62 = vsel %vm1547_vm7, 1.0, %v2980_v51  ;;  %vm2542_vm0 = vmpackc.low %vm1574_vm2, %vm1573_vm3  ;;  %p2550_p13 = scmp.ne.s32.totalorder %s2952_s29, 1 }
 0x3ad   : > { %2664 = vmatprep.subr.bf16.mxu1 %v1649_v18  ;;  %v1652_v0 = vpack.c.bf16 %v1648_v38, %v1647_v46  ;;  %v2514_v7 = vsel %vm1548_vm8, 1.0, %v2980_v51  ;;  %v2515_v1 = vsel %vm1549_vm9, 1.0, %v2980_v51  ;;  %v1686_v57 = vpack.c.bf16 %v2513_v62, %v2512_v12  ;;  %vm2546_vm3 = vmpackc.low %vm1578_vm14, %vm1577_vm15  ;;  %v1833_v61 = vld [vmem:[#allocation3 + $0x10] sm:$0xff]  ;;  %v1834_v55 = vld [vmem:[#allocation3 + $0x18] sm:$0xff] }
 0x3ae   : > { %2665 = vmatpush3.bf16.msra.mxu1 %v1649_v18  ;;  %2672 = vmatprep.mubr.msk.bf16.mxu1 %vm1693_vm12, %v1685_v19  ;;  %v1687_v17 = vpack.c.bf16 %v2515_v1, %v2514_v7  ;;  %v2516_v22 = vsel %vm1550_vm10, 1.0, %v2980_v51  ;;  %v2517_v39 = vsel %vm1551_vm11, 1.0, %v2980_v51  ;;  %vm4055_vm4 = vcmp.eq.s32.totalorder %v3624_v32, %v3669_v24 }
 0x3af   : > { %2666 = vmatprep.subr.bf16.mxu1 %v1650_v36  ;;  %v2518_v60 = vsel %vm4055_vm4, 1.0, %v2980_v51  ;;  %vm4056_vm5 = vcmp.eq.s32.totalorder %v3624_v32, %v3671_v53  ;;  %v1688_v34 = vpack.c.bf16 %v2517_v39, %v2516_v22  ;;  %vm4057_vm6 = vcmp.eq.s32.totalorder %v3624_v32, %v3677_v8 }
 0x3b0   : > { %v2519_v21 = vsel %vm4056_vm5, 1.0, %v2980_v51  ;;  %v2520_v9 = vsel %vm4057_vm6, 1.0, %v2980_v51  ;;  %vm4058_vm7 = vcmp.eq.s32.totalorder %v3624_v32, %v3679_v41  ;;  %vm4059_vm8 = vcmp.eq.s32.totalorder %v3624_v32, %v3685_v3 }
 0x3b1   : > { %v1689_v2 = vpack.c.bf16 %v2519_v21, %v2518_v60  ;;  %v2521_v42 = vsel %vm4058_vm7, 1.0, %v2980_v51  ;;  %v2522_v24 = vsel %vm4059_vm8, 1.0, %v2980_v51  ;;  %vm4060_vm9 = vcmp.eq.s32.totalorder %v3624_v32, %v3687_v20 }
 0x3b2   : > { %2667 = vmatpush3.bf16.msra.mxu1 %v1650_v36  ;;  %v2523_v53 = vsel %vm4060_vm9, 1.0, %v2980_v51  ;;  %v1690_v13 = vpack.c.bf16 %v2521_v42, %v2520_v9  ;;  %vm4061_vm10 = vcmp.eq.s32.totalorder %v3624_v32, %v3693_v26  ;;  %vm4062_vm11 = vcmp.eq.s32.totalorder %v3624_v32, %v3695_v30  ;;  %v1838_v42 = vld [vmem:[#allocation3 + $0x38] sm:$0xff] }
 0x3b3   : > { %2668 = vmatprep.subr.bf16.mxu1 %v1651_v10  ;;  %v1691_v52 = vpack.c.bf16 %v2523_v53, %v2522_v24  ;;  %v2524_v8 = vsel %vm4061_vm10, 1.0, %v2980_v51  ;;  %v2525_v41 = vsel %vm4062_vm11, 1.0, %v2980_v51  ;;  %v2981_v20 = vmov 1.0|1.0  }
 0x3b4   : > { %v1692_v3 = vpack.c.bf16 %v2525_v41, %v2524_v8  ;;  %2704 = vmatprep.mubr.msk.bf16.mxu0 %vm2542_vm0, %v2981_v20  ;;  %vm4064_vm4 = vcmp.eq.s32.totalorder %v3727_v45, %v3718_v40  ;;  %v1837_v45 = vld [vmem:[#allocation3 + $0x30] sm:$0xff] }
 0x3b5   : > { %vm2548_vm5 = vmpackc.low %vm4064_vm4, %vm1579_vm13 }
 0x3b6   : > { %2669 = vmatpush3.bf16.msra.mxu1 %v1651_v10 }
 0x3b7   : > { %2670 = vmatprep.subr.bf16.mxu1 %v1652_v0 }
 0x3ba   : > { %2671 = vmatpush3.bf16.msra.mxu1 %v1652_v0 }
 0x3bd   : > { %2673 = vmatmul.mubr.msk.bf16.vlgmr.msra.gmra.mrb[0].mxu1 %vm1693_vm12, %v1686_v57 }
 0x3be   : > { %2676 = vmatprep.mubr.msk.bf16.mxu1 %vm1693_vm12, %v1687_v17 }
 0x3c5   : > { %2677 = vmatmul.mubr.msk.bf16.gmra.mrb[4].mxu1 %vm1693_vm12, %v1688_v34 }
 0x3c6   : > { %2680 = vmatprep.mubr.msk.bf16.mxu1 %vm1693_vm12, %v1689_v2  ;;  %v1835_v2 = vld [vmem:[#allocation3 + $0x20] sm:$0xff] }
 0x3cd   : > { %2681 = vmatmul.mubr.msk.bf16.gmra.mrb[8].mxu1 %vm1693_vm12, %v1690_v13  ;;  %v1836_v13 = vld [vmem:[#allocation3 + $0x28] sm:$0xff] }
 0x3ce   : > { %2684 = vmatprep.mubr.msk.bf16.mxu1 %vm1693_vm12, %v1691_v52 }
 0x3d5   : > { %2685 = vmatmul.mubr.msk.bf16.gmra.mrb[12].mxu1 %vm1693_vm12, %v1692_v3  ;;  %vm4063_vm12 = vcmp.eq.s32.totalorder %v3708_v43, %v3718_v40  ;;  %v1831_v43 = vld [vmem:[#allocation3] sm:$0xff] }
 0x3d6   : > { %vm2544_vm2 = vmpackc.low %vm4063_vm12, %vm1575_vm1  ;;  %vm1940_vm1 = vcmask 261120  }
 0x490   : > { %v2674_v56 = vpop.f32.mrb[0].mxu1 }
 0x491   : > { %v1752_v26 = vpop.f32.mrb[1].mxu1  ;;  %v1817_v4 = vmul.f32 %v2674_v56, %v3747_v48  ;;  %v2057_v56 = vld [vmem:[%s4040_s10] sm:$0xff] (!%p2550_p13) }
 0x492   : > { %v2675_v18 = vpop.f32.mrb[2].mxu1  ;;  %v1815_v51 = vmul.f32 %v1752_v26, %v3667_v58  ;;  %v2058_v26 = vld [vmem:[%s4040_s10 + $0x8] sm:$0xff] (!%p2550_p13) }
 0x493   : > { %v1818_v32 = vmul.f32 %v2675_v18, %v3738_v59  ;;  %v1755_v30 = vpop.f32.mrb[3].mxu1  ;;  %v2059_v18 = vld [vmem:[%s4040_s10 + $0x10] sm:$0xff] (!%p2550_p13) }
 0x494   : > { %v1816_v15 = vmul.f32 %v1755_v30, %v3664_v47  ;;  %v2049_v30 = vld [vmem:[#allocation2] sm:$0xff] (!%p2550_p13) }
 0x495   : > { %v1860_v63 = vpack.c.bf16 %v1818_v32, %v1817_v4  ;;  %v2752_v4 = vpack.c.bf16 (!%p2550_p13), %v2058_v26, %v2057_v56  ;;  %v2060_v32 = vld [vmem:[%s4040_s10 + $0x18] sm:$0xff] (!%p2550_p13) }
 0x496   : > { %v1859_v25 = vpack.c.bf16 %v1816_v15, %v1815_v51  ;;  %v2053_v51 = vld [vmem:[#allocation2 + $0x20] sm:$0xff] (!%p2550_p13)  ;;  %v2982_v15 = vmov (!%p2550_p13), 0  }
 0x497   : > { %2883 = vset.pattern.permute.xlu1 (!%p2550_p13), %v2982_v15  ;;  %2882 = vset.pattern.permute.xlu0 (!%p2550_p13), %v2982_v15 }
 0x498   : > { %v2678_v36 = vpop.f32.mrb[4].mxu1  ;;  %2688 = vmatprep.subr.bf16.mxu0 %v1859_v25  ;;  %2726 = vmatprep.mubr.msk.f32.mxu1 (!%p2550_p13), %vm1940_vm1, %v2053_v51 }
 0x499   : > { %v1768_v11 = vpop.f32.mrb[5].mxu1  ;;  %2689 = vmatpush3.bf16.msra.mxu0 %v1859_v25  ;;  %v1821_v33 = vmul.f32 %v2678_v36, %v3761_v29  ;;  %2768 = vmatprep.subr.bf16.mxu1 (!%p2550_p13), %v2752_v4  ;;  %v1955_v25 = vld [vmem:[#allocation4 + $0x10] sm:$0xff] (!%p2550_p13)  ;;  %v1953_v36 = vld [vmem:[#allocation4] sm:$0xff] (!%p2550_p13) }
 0x49a   : > { %v2679_v14 = vpop.f32.mrb[6].mxu1  ;;  %2690 = vmatprep.subr.bf16.mxu0 %v1860_v63  ;;  %v1819_v59 = vmul.f32 %v1768_v11, %v3755_v27  ;;  %2770 = vmatpush3.bf16.msra.mxu1 (!%p2550_p13), %v2752_v4  ;;  %v1956_v11 = vld [vmem:[#allocation4 + $0x18] sm:$0xff] (!%p2550_p13)  ;;  %vm1963_vm13 = vcmp.gt.f32.partialorder (!%p2550_p13), %v1955_v25, 0.0  ;;  %vm1961_vm14 = vcmp.gt.f32.partialorder (!%p2550_p13), %v1953_v36, 0.0 }
 0x49b   : > { %v1822_v19 = vmul.f32 %v2679_v14, %v3758_v28  ;;  %v1771_v48 = vpop.f32.mrb[7].mxu1  ;;  %v1971_v14 = vmax.f32 (!%p2550_p13), %v1955_v25, 1.0  ;;  %vm1964_vm15 = vcmp.gt.f32.partialorder (!%p2550_p13), %v1956_v11, 0.0 }
 0x49c   : > { %v1820_v10 = vmul.f32 %v1771_v48, %v3752_v5  ;;  %v1958_v48 = vld [vmem:[#allocation4 + $0x28] sm:$0xff] (!%p2550_p13) }
 0x49d   : > { %v1862_v58 = vpack.c.bf16 %v1822_v19, %v1821_v33  ;;  %2691 = vmatpush3.bf16.msra.mxu0 %v1860_v63  ;;  %v2756_v63 = vpack.c.bf16 (!%p2550_p13), %v2060_v32, %v2059_v18  ;;  %v1969_v33 = vmax.f32 (!%p2550_p13), %v1953_v36, 1.0  ;;  %v1954_v19 = vld [vmem:[#allocation4 + $0x8] sm:$0xff] (!%p2550_p13)  ;;  %2884 = vrcp.f32 (!%p2550_p13), %v1971_v14  ;;  %v2559_v18 = vld [vmem:[%s4041_s11] ss:$0 sm:$0xff] (!%p2550_p13) }
 0x49e   : > { %v1861_v47 = vpack.c.bf16 %v1820_v10, %v1819_v59  ;;  %v1972_v59 = vmax.f32 (!%p2550_p13), %v1956_v11, 1.0  ;;  %v1970_v10 = vmax.f32 (!%p2550_p13), %v1954_v19, 1.0  ;;  %vm1962_vm6 = vcmp.gt.f32.partialorder (!%p2550_p13), %v1954_v19, 0.0 }
 0x49f   : > { %2769 = vmatprep.subr.bf16.mxu1 (!%p2550_p13), %v2756_v63  ;;  %2886 = vrcp.f32 (!%p2550_p13), %v1969_v33  ;;  %vm1966_vm7 = vcmp.gt.f32.partialorder (!%p2550_p13), %v1958_v48, 0.0 }
 0x4a0   : > { %v2682_v46 = vpop.f32.mrb[8].mxu1  ;;  %2692 = vmatprep.subr.bf16.mxu0 %v1861_v47  ;;  %2771 = vmatpush3.bf16.msra.mxu1 (!%p2550_p13), %v2756_v63  ;;  %2888 = vrcp.f32 (!%p2550_p13), %v1972_v59 }
 0x4a1   : > { %v1784_v38 = vpop.f32.mrb[9].mxu1  ;;  %2693 = vmatpush3.bf16.msra.mxu0 %v1861_v47  ;;  %v1825_v12 = vmul.f32 %v2682_v46, %v3773_v16  ;;  %v1974_v47 = vmax.f32 (!%p2550_p13), %v1958_v48, 1.0  ;;  %v2050_v46 = vld [vmem:[#allocation2 + $0x8] sm:$0xff] (!%p2550_p13)  ;;  %2890 = vrcp.f32 (!%p2550_p13), %v1970_v10 }
 0x4a2   : > { %v2683_v0 = vpop.f32.mrb[10].mxu1  ;;  %2694 = vmatprep.subr.bf16.mxu0 %v1862_v58  ;;  %v1823_v28 = vmul.f32 %v1784_v38, %v3767_v6  ;;  %v2054_v38 = vld [vmem:[#allocation2 + $0x28] sm:$0xff] (!%p2550_p13) }
 0x4a3   : > { %v1826_v29 = vmul.f32 %v2683_v0, %v3770_v50  ;;  %v1787_v62 = vpop.f32.mrb[11].mxu1  ;;  %2727 = vmatmul.mubr.msk.f32.vlgmr.msra.gmra.mrb[0].mxu1 (!%p2550_p13), %vm1940_vm1, %v2054_v38  ;;  %2892 = vrcp.f32 (!%p2550_p13), %v1974_v47 }
 0x4a4   : > { %v1824_v27 = vmul.f32 %v1787_v62, %v3764_v49  ;;  %v2055_v62 = vld [vmem:[#allocation2 + $0x30] sm:$0xff] (!%p2550_p13) }
 0x4a5   : > { %v1864_v7 = vpack.c.bf16 %v1826_v29, %v1825_v12  ;;  %2695 = vmatpush3.bf16.msra.mxu0 %v1862_v58  ;;  %v1957_v58 = vld [vmem:[#allocation4 + $0x20] sm:$0xff] (!%p2550_p13)  ;;  %v1960_v12 = vld [vmem:[#allocation4 + $0x38] sm:$0xff] (!%p2550_p13)  ;;  %v2051_v29 = vld [vmem:[#allocation2 + $0x10] sm:$0xff] (!%p2550_p13)  ;;  %2729 = vmatprep.mubr.msk.f32.mxu1 (!%p2550_p13), %vm1940_vm1, %v2055_v62 }
 0x4a6   : > { %v1863_v5 = vpack.c.bf16 %v1824_v27, %v1823_v28  ;;  %v1973_v0 = vmax.f32 (!%p2550_p13), %v1957_v58, 1.0  ;;  %v1959_v28 = vld [vmem:[#allocation4 + $0x30] sm:$0xff] (!%p2550_p13)  ;;  %v1976_v27 = vmax.f32 (!%p2550_p13), %v1960_v12, 1.0  ;;  %vm1965_vm8 = vcmp.gt.f32.partialorder (!%p2550_p13), %v1957_v58, 0.0 }
 0x4a7   : > { %vm1968_vm9 = vcmp.gt.f32.partialorder (!%p2550_p13), %v1960_v12, 0.0  ;;  %vm1967_vm10 = vcmp.gt.f32.partialorder (!%p2550_p13), %v1959_v28, 0.0 }
 0x4a8   : > { %v2686_v1 = vpop.f32.mrb[12].mxu1  ;;  %2696 = vmatprep.subr.bf16.mxu0 %v1863_v5  ;;  %2894 = vrcp.f32 (!%p2550_p13), %v1973_v0 }
 0x4a9   : > { %v1800_v57 = vpop.f32.mrb[13].mxu1  ;;  %2697 = vmatpush3.bf16.msra.mxu0 %v1863_v5  ;;  %v1829_v22 = vmul.f32 %v2686_v1, %v3785_v35  ;;  %v2056_v5 = vld [vmem:[#allocation2 + $0x38] sm:$0xff] (!%p2550_p13)  ;;  %v1975_v1 = vmax.f32 (!%p2550_p13), %v1959_v28, 1.0  ;;  %2896 = vrcp.f32 (!%p2550_p13), %v1976_v27 }
 0x4aa   : > { %v2687_v17 = vpop.f32.mrb[14].mxu1  ;;  %2698 = vmatprep.subr.bf16.mxu0 %v1864_v7  ;;  %v1827_v50 = vmul.f32 %v1800_v57, %v3779_v31  ;;  %2730 = vmatmul.mubr.msk.f32.gmra.mrb[2].mxu1 (!%p2550_p13), %vm1940_vm1, %v2056_v5  ;;  %v2885_v57 = vpop.eup (!%p2550_p13), %2884 }
 0x4ab   : > { %v1830_v16 = vmul.f32 %v2687_v17, %v3782_v23  ;;  %v1803_v39 = vpop.f32.mrb[15].mxu1  ;;  %v1832_v23 = vld [vmem:[#allocation3 + $0x8] sm:$0xff]  ;;  %2898 = vrcp.f32 (!%p2550_p13), %v1975_v1  ;;  %v2887_v17 = vpop.eup (!%p2550_p13), %2886 }
 0x4ac   : > { %v1828_v6 = vmul.f32 %v1803_v39, %v3776_v44  ;;  %v1985_v39 = vsel (!%p2550_p13), %vm1961_vm14, %v2887_v17, 0.0 }
 0x4ad   : > { %v1866_v49 = vpack.c.bf16 %v1830_v16, %v1829_v22  ;;  %2699 = vmatpush3.bf16.msra.mxu0 %v1864_v7  ;;  %v2052_v7 = vld [vmem:[#allocation2 + $0x18] sm:$0xff] (!%p2550_p13)  ;;  %v1987_v22 = vsel (!%p2550_p13), %vm1963_vm13, %v2885_v57, 0.0  ;;  %v2889_v16 = vpop.eup (!%p2550_p13), %2888  ;;  %2003 = vperm.xlu0 (!%p2550_p13), %2882, %v1985_v39  }
 0x4ae   : > { %v1865_v60 = vpack.c.bf16 %v1828_v6, %v1827_v50  ;;  %2013 = vperm.xlu1 (!%p2550_p13), %2883, %v1987_v22   ;;  %v2891_v50 = vpop.eup (!%p2550_p13), %2890  ;;  %v1988_v6 = vsel (!%p2550_p13), %vm1964_vm15, %v2889_v16, 0.0 }
 0x4b0   : > { %2700 = vmatprep.subr.bf16.mxu0 %v1865_v60 }
 0x4b1   : > { %2701 = vmatpush3.bf16.msra.mxu0 %v1865_v60  ;;  %v1986_v60 = vsel (!%p2550_p13), %vm1962_vm6, %v2891_v50, 0.0 }
 0x4b2   : > { %2702 = vmatprep.subr.bf16.mxu0 %v1866_v49  ;;  %2018 = vperm.xlu1 (!%p2550_p13), %2883, %v1988_v6  }
 0x4b3   : > { %2008 = vperm.xlu0 (!%p2550_p13), %2882, %v1986_v60  }
 0x4b5   : > { %2703 = vmatpush3.bf16.msra.mxu0 %v1866_v49  ;;  %v2893_v49 = vpop.eup (!%p2550_p13), %2892 }
 0x4b6   : > { %2753 = vmatprep.subr.bf16.mxu0 (!%p2550_p13), %v2752_v4 }
 0x4b8   : > { %2705 = vmatmul.mubr.msk.bf16.vlgmr.msra.gmra.mrb[16].mxu0 %vm2544_vm2, %v2981_v20 }
 0x4b9   : > { %2708 = vmatprep.mubr.msk.bf16.mxu0 %vm2546_vm3, %v2981_v20  ;;  %2755 = vmatpush3.bf16.msra.mxu0 (!%p2550_p13), %v2752_v4 }
 0x4ba   : > { %2757 = vmatprep.subr.bf16.mxu0 (!%p2550_p13), %v2756_v63 }
 0x4bd   : > { %2759 = vmatpush3.bf16.msra.mxu0 (!%p2550_p13), %v2756_v63 }
 0x4c0   : > { %2709 = vmatmul.mubr.msk.bf16.gmra.mrb[20].mxu0 %vm2548_vm5, %v2981_v20 }
 0x4c1   : > { %2720 = vmatprep.mubr.msk.f32.mxu0 (!%p2550_p13), %vm1940_vm1, %v2049_v30 }
 0x4c8   : > { %2721 = vmatmul.mubr.msk.f32.vlgmr.msra.gmra.mrb[0].mxu0 (!%p2550_p13), %vm1940_vm1, %v2050_v46 }
 0x4c9   : > { %2723 = vmatprep.mubr.msk.f32.mxu0 (!%p2550_p13), %vm1940_vm1, %v2051_v29 }
 0x4cc   : > { %2724 = vmatmul.mubr.msk.f32.gmra.mrb[2].mxu0 (!%p2550_p13), %vm1940_vm1, %v2052_v7 }
 0x576   : > { %v2728_v4 = vpop.f32.mrb[0].mxu1 (!%p2550_p13) }
 0x577   : > { %v2171_v25 = vpop.f32.mrb[1].mxu1 (!%p2550_p13) }
 0x57d   : > { %v2731_v38 = vpop.f32.mrb[2].mxu1 (!%p2550_p13) }
 0x57e   : > { %v2181_v27 = vpop.f32.mrb[3].mxu1 (!%p2550_p13) }
 0x58b   : > { %v2706_v37 = vpop.f32.mrb[16].mxu0 }
 0x58c   : > { %v1934_v44 = vadd.f32 %v2706_v37, %v1833_v61  ;;  %v1901_v31 = vpop.f32.mrb[17].mxu0  ;;  %v2895_v61 = vpop.eup (!%p2550_p13), %2894 }
 0x58d   : > { %v1932_v35 = vadd.f32 %v1901_v31, %v1831_v43  ;;  %v2707_v21 = vpop.f32.mrb[18].mxu0  ;;  %v1990_v43 = vsel (!%p2550_p13), %vm1966_vm7, %v2893_v49, 0.0  ;;  %v2897_v37 = vpop.eup (!%p2550_p13), %2896 }
 0x58e   : > { %1943 = vst.msk [vmem:[#allocation3 + $0x10] sm:$0xff] %vm1940_vm1, %v1934_v44  ;;  %v1935_v54 = vadd.f32 %v2707_v21, %v1834_v55  ;;  %v1904_v34 = vpop.f32.mrb[19].mxu0  ;;  %v1989_v55 = vsel (!%p2550_p13), %vm1965_vm8, %v2895_v61, 0.0  ;;  %v2899_v44 = vpop.eup (!%p2550_p13), %2898  ;;  %2028 = vperm.xlu1 (!%p2550_p13), %2883, %v1990_v43   ;;  %v1992_v31 = vsel (!%p2550_p13), %vm1968_vm9, %v2897_v37, 0.0 }
 0x58f   : > { %1941 = vst.msk [vmem:[#allocation3] sm:$0xff] %vm1940_vm1, %v1932_v35  ;;  %v1933_v40 = vadd.f32 %v1904_v34, %v1832_v23  ;;  %2023 = vperm.xlu0 (!%p2550_p13), %2882, %v1989_v55   ;;  %v1991_v23 = vsel (!%p2550_p13), %vm1967_vm10, %v2899_v44, 0.0  ;;  %v2014_v35 = vpop.permute.xlu1 (!%p2550_p13), %2013  ;;  %v2004_v21 = vpop.permute.xlu0 (!%p2550_p13), %2003 }
 0x590   : > { %1944 = vst.msk [vmem:[#allocation3 + $0x18] sm:$0xff] %vm1940_vm1, %v1935_v54 }
 0x591   : > { %1942 = vst.msk [vmem:[#allocation3 + $0x8] sm:$0xff] %vm1940_vm1, %v1933_v40 }
 0x592   : > { %2038 = vperm.xlu1 (!%p2550_p13), %2883, %v1992_v31  }
 0x593   : > { %v2710_v9 = vpop.f32.mrb[20].mxu0  ;;  %1952 = sbr.rel (%p2550_p13) target bundleno = 1564 (0x61c), region = 92  ;;  %2033 = vperm.xlu0 (!%p2550_p13), %2882, %v1991_v23   ;;  %v2019_v54 = vpop.permute.xlu1 (!%p2550_p13), %2018 }
 0x594   : > { %v1938_v24 = vadd.f32 %v2710_v9, %v1837_v45  ;;  %v1917_v53 = vpop.f32.mrb[21].mxu0  ;;  %v2009_v34 = vpop.permute.xlu0 (!%p2550_p13), %2008 }
 0x595   : > { %v1936_v52 = vadd.f32 %v1917_v53, %v1835_v2  ;;  %v2711_v8 = vpop.f32.mrb[22].mxu0  ;;  %v1995_v32 = vld [vmem:[#allocation3 + $0x10] sm:$0xff] (!%p2550_p13) }
 0x596   : > { %1947 = vst.msk [vmem:[#allocation3 + $0x30] sm:$0xff] %vm1940_vm1, %v1938_v24  ;;  %v1939_v41 = vadd.f32 %v2711_v8, %v1838_v42  ;;  %v1920_v3 = vpop.f32.mrb[23].mxu0  ;;  %v1993_v42 = vld [vmem:[#allocation3] sm:$0xff] (!%p2550_p13)  ;;  %v2043_v59 = vmul.f32 (!%p2550_p13), %v2014_v35, %v1995_v32 }
 0x597   : > { %1945 = vst.msk [vmem:[#allocation3 + $0x20] sm:$0xff] %vm1940_vm1, %v1936_v52  ;;  %v1937_v20 = vadd.f32 %v1920_v3, %v1836_v13  ;;  %v1996_v3 = vld [vmem:[#allocation3 + $0x18] sm:$0xff] (!%p2550_p13) }
 0x598   : > { %1948 = vst.msk [vmem:[#allocation3 + $0x38] sm:$0xff] %vm1940_vm1, %v1939_v41  ;;  %v1994_v2 = vld [vmem:[#allocation3 + $0x8] sm:$0xff] (!%p2550_p13)  ;;  %v2041_v41 = vmul.f32 (!%p2550_p13), %v2004_v21, %v1993_v42  ;;  %v2044_v14 = vmul.f32 (!%p2550_p13), %v2019_v54, %v1996_v3 }
 0x599   : > { %1946 = vst.msk [vmem:[#allocation3 + $0x28] sm:$0xff] %vm1940_vm1, %v1937_v20  ;;  %v2042_v53 = vmul.f32 (!%p2550_p13), %v2009_v34, %v1994_v2 }
 0x59b   : > { %v2722_v26 = vpop.f32.mrb[0].mxu0 }
 0x59c   : > { %v2191_v51 = vadd.f32 %v2722_v26, %v2042_v53  ;;  %v2151_v63 = vpop.f32.mrb[1].mxu0 }
 0x59d   : > { %v1999_v30 = vld [vmem:[#allocation3 + $0x30] sm:$0xff]  ;;  %v2190_v36 = vadd.f32 %v2151_v63, %v2041_v41 }
 0x59e   : > { %v1997_v24 = vld [vmem:[#allocation3 + $0x20] sm:$0xff]  ;;  %v2206_v19 = vadd.f32 %v2559_v18, %v2191_v51 }
 0x59f   : > { %v2000_v56 = vld [vmem:[#allocation3 + $0x38] sm:$0xff]  ;;  %v2205_v58 = vadd.f32 %v2559_v18, %v2190_v36  ;;  %v2725_v46 = vpop.f32.mrb[2].mxu0 }
 0x5a0   : > { %v1998_v9 = vld [vmem:[#allocation3 + $0x28] sm:$0xff]  ;;  %v2214_v0 = vmax.f32 %v2206_v19, 0.0  ;;  %v2193_v29 = vadd.f32 %v2725_v46, %v2044_v14  ;;  %v2161_v28 = vpop.f32.mrb[3].mxu0 }
 0x5a1   : > { %v2213_v7 = vmax.f32 %v2205_v58, 0.0  ;;  %v2192_v1 = vadd.f32 %v2161_v28, %v2043_v59 }
 0x5a2   : > { %2222 = vst.msk [vmem:[#allocation2 + $0x8] sm:$0xff] %vm1940_vm1, %v2214_v0  ;;  %v2208_v17 = vadd.f32 %v2559_v18, %v2193_v29 }
 0x5a3   : > { %2221 = vst.msk [vmem:[#allocation2] sm:$0xff] %vm1940_vm1, %v2213_v7  ;;  %v2207_v16 = vadd.f32 %v2559_v18, %v2192_v1 }
 0x5a4   : > { %v2216_v50 = vmax.f32 %v2208_v17, 0.0 }
 0x5a5   : > { %v2215_v49 = vmax.f32 %v2207_v16, 0.0 }
 0x5a6   : > { %2224 = vst.msk [vmem:[#allocation2 + $0x18] sm:$0xff] %vm1940_vm1, %v2216_v50 }
 0x5a7   : > { %2223 = vst.msk [vmem:[#allocation2 + $0x10] sm:$0xff] %vm1940_vm1, %v2215_v49 }
 0x60d   : > { %v2029_v40 = vpop.permute.xlu1 %2028 }
 0x60e   : > { %v2024_v45 = vpop.permute.xlu0 %2023  ;;  %v2046_v13 = vmul.f32 %v2029_v40, %v1998_v9 }
 0x60f   : > { %v2045_v20 = vmul.f32 %v2024_v45, %v1997_v24 }
 0x610   : > { %v2195_v15 = vadd.f32 %v2728_v4, %v2046_v13 }
 0x611   : > { %v2039_v52 = vpop.permute.xlu1 %2038  ;;  %v2194_v11 = vadd.f32 %v2171_v25, %v2045_v20 }
 0x612   : > { %v2034_v8 = vpop.permute.xlu0 %2033  ;;  %v2048_v33 = vmul.f32 %v2039_v52, %v2000_v56  ;;  %v2210_v48 = vadd.f32 %v2559_v18, %v2195_v15 }
 0x613   : > { %v2047_v10 = vmul.f32 %v2034_v8, %v1999_v30  ;;  %v2209_v47 = vadd.f32 %v2559_v18, %v2194_v11 }
 0x614   : > { %v2218_v12 = vmax.f32 %v2210_v48, 0.0  ;;  %v2197_v62 = vadd.f32 %v2731_v38, %v2048_v33 }
 0x615   : > { %v2217_v5 = vmax.f32 %v2209_v47, 0.0  ;;  %v2196_v57 = vadd.f32 %v2181_v27, %v2047_v10 }
 0x616   : > { %2226 = vst.msk [vmem:[#allocation2 + $0x28] sm:$0xff] %vm1940_vm1, %v2218_v12  ;;  %v2212_v22 = vadd.f32 %v2559_v18, %v2197_v62 }
 0x617   : > { %2225 = vst.msk [vmem:[#allocation2 + $0x20] sm:$0xff] %vm1940_vm1, %v2217_v5  ;;  %v2211_v39 = vadd.f32 %v2559_v18, %v2196_v57 }
 0x618   : > { %v2220_v6 = vmax.f32 %v2212_v22, 0.0 }
 0x619   : > { %v2219_v60 = vmax.f32 %v2211_v39, 0.0 }
 0x61a   : > { %2228 = vst.msk [vmem:[#allocation2 + $0x38] sm:$0xff] %vm1940_vm1, %v2220_v6 }
 0x61b   : > { %2227 = vst.msk [vmem:[#allocation2 + $0x30] sm:$0xff] %vm1940_vm1, %v2219_v60 }
 0x61c PF: > { %p2229_p0 = scmp.eq.s32.totalorder %s2956_s30, 3 }
 0x61e   : > { %p2230_p1 = pnand %p2229_p0, %p1949_p12 }
 0x61f   : > { %v2242_v61 = vld [vmem:[%s4042_s12] sm:$0xff] (!%p2230_p1)  ;;  %v2243_v43 = vld [vmem:[%s4042_s12 + $0x8] sm:$0xff] (!%p2230_p1)  ;;  %v2244_v37 = vld [vmem:[%s4042_s12 + $0x10] sm:$0xff] (!%p2230_p1) }
 0x620   : > { %2233 = sbr.rel (%p2230_p1) target bundleno = 1799 (0x707), region = 96  ;;  %v2760_v55 = vpack.c.bf16 (!%p2230_p1), %v2243_v43, %v2242_v61  ;;  %v2245_v44 = vld [vmem:[%s4042_s12 + $0x18] sm:$0xff] (!%p2230_p1)  ;;  %v2234_v31 = vld [vmem:[#allocation2] sm:$0xff] (!%p2230_p1)  ;;  %v2235_v21 = vld [vmem:[#allocation2 + $0x8] sm:$0xff] (!%p2230_p1) }
 0x621   : > { %v2238_v23 = vld [vmem:[#allocation2 + $0x20] sm:$0xff] (!%p2230_p1)  ;;  %v2764_v35 = vpack.c.bf16 (!%p2230_p1), %v2245_v44, %v2244_v37  ;;  %2740 = vmatprep.mubr.msk.f32.mxu0 (!%p2230_p1), %vm1940_vm1, %v2234_v31  ;;  %v2239_v54 = vld [vmem:[#allocation2 + $0x28] sm:$0xff] (!%p2230_p1)  ;;  %v2236_v34 = vld [vmem:[#allocation2 + $0x10] sm:$0xff] (!%p2230_p1) }
 0x622   : > { %2746 = vmatprep.mubr.msk.f32.mxu1 (!%p2230_p1), %vm1940_vm1, %v2238_v23  ;;  %2761 = vmatprep.subr.bf16.mxu0 (!%p2230_p1), %v2760_v55  ;;  %v2240_v40 = vld [vmem:[#allocation2 + $0x30] sm:$0xff] (!%p2230_p1)  ;;  %v2237_v45 = vld [vmem:[#allocation2 + $0x18] sm:$0xff] (!%p2230_p1)  ;;  %v2560_v9 = vld [vmem:[%s4043_s13] ss:$0 sm:$0xff] (!%p2230_p1) }
 0x623   : > { %2772 = vmatprep.subr.bf16.mxu1 (!%p2230_p1), %v2760_v55  ;;  %2763 = vmatpush3.bf16.msra.mxu0 (!%p2230_p1), %v2760_v55  ;;  %v2241_v2 = vld [vmem:[#allocation2 + $0x38] sm:$0xff] (!%p2230_p1) }
 0x624   : > { %2774 = vmatpush3.bf16.msra.mxu1 (!%p2230_p1), %v2760_v55  ;;  %2765 = vmatprep.subr.bf16.mxu0 (!%p2230_p1), %v2764_v35 }
 0x625   : > { %2773 = vmatprep.subr.bf16.mxu1 (!%p2230_p1), %v2764_v35 }
 0x627   : > { %2767 = vmatpush3.bf16.msra.mxu0 %v2764_v35 }
 0x628   : > { %2775 = vmatpush3.bf16.msra.mxu1 %v2764_v35 }
 0x62a   : > { %2741 = vmatmul.mubr.msk.f32.vlgmr.msra.gmra.mrb[0].mxu0 %vm1940_vm1, %v2235_v21 }
 0x62b   : > { %2747 = vmatmul.mubr.msk.f32.vlgmr.msra.gmra.mrb[0].mxu1 %vm1940_vm1, %v2239_v54  ;;  %2743 = vmatprep.mubr.msk.f32.mxu0 %vm1940_vm1, %v2236_v34 }
 0x62c   : > { %2749 = vmatprep.mubr.msk.f32.mxu1 %vm1940_vm1, %v2240_v40 }
 0x62e   : > { %2744 = vmatmul.mubr.msk.f32.gmra.mrb[2].mxu0 %vm1940_vm1, %v2237_v45 }
 0x62f   : > { %2750 = vmatmul.mubr.msk.f32.gmra.mrb[2].mxu1 %vm1940_vm1, %v2241_v2 }
 0x6fd   : > { %v2742_v42 = vpop.f32.mrb[0].mxu0 }
 0x6fe   : > { %v2748_v24 = vpop.f32.mrb[0].mxu1  ;;  %v2349_v53 = vadd.f32 %v2742_v42, %v2560_v9  ;;  %v2343_v52 = vpop.f32.mrb[1].mxu0 }
 0x6ff   : > { %v2369_v13 = vadd.f32 %v2748_v24, %v2560_v9  ;;  %v2363_v8 = vpop.f32.mrb[1].mxu1  ;;  %v2344_v41 = vadd.f32 %v2560_v9, %v2343_v52 }
 0x700   : > { %v2364_v3 = vadd.f32 %v2560_v9, %v2363_v8  ;;  %2383 = vst [vmem:[#allocation5 + $0x8] sm:$0xff] %v2349_v53 }
 0x701   : > { %2387 = vst [vmem:[#allocation5 + $0x28] sm:$0xff] %v2369_v13  ;;  %2382 = vst [vmem:[#allocation5] sm:$0xff] %v2344_v41  ;;  %v2745_v20 = vpop.f32.mrb[2].mxu0 }
 0x702   : > { %2386 = vst [vmem:[#allocation5 + $0x20] sm:$0xff] %v2364_v3  ;;  %v2751_v56 = vpop.f32.mrb[2].mxu1  ;;  %v2359_v26 = vadd.f32 %v2745_v20, %v2560_v9  ;;  %v2353_v4 = vpop.f32.mrb[3].mxu0 }
 0x703   : > { %v2379_v18 = vadd.f32 %v2751_v56, %v2560_v9  ;;  %v2373_v32 = vpop.f32.mrb[3].mxu1  ;;  %v2354_v30 = vadd.f32 %v2560_v9, %v2353_v4 }
 0x704   : > { %v2374_v51 = vadd.f32 %v2560_v9, %v2373_v32  ;;  %2385 = vst [vmem:[#allocation5 + $0x18] sm:$0xff] %v2359_v26 }
 0x705   : > { %2389 = vst [vmem:[#allocation5 + $0x38] sm:$0xff] %v2379_v18  ;;  %2384 = vst [vmem:[#allocation5 + $0x10] sm:$0xff] %v2354_v30 }
 0x706   : > { %2388 = vst [vmem:[#allocation5 + $0x30] sm:$0xff] %v2374_v51 }
 0x707 PF: > { %s4065_s16 = sadd.s32 4294967295, %s2968_s17   ;;  %s2983_s28 = smov [#allocation5]  }
 0x708   : > { %p3989_p2 = scmp.eq.s32.totalorder %s4065_s16, 7  ;;  %s2396_s23 = sshll.u32 %s2983_s28, 4  ;;  %s2397_s23 = int_to_ptr.vmem [resolvable:$true] %s2396_s23 }
 0x709   : > { %s2900_s24 = scalar_lea.vmem %s2397_s23, 1024  ;;  %p2907_p6 = scmp.lt.s32.totalorder %s2397_s23, %s2397_s23 }
 0x70a   : > { %p2901_p3 = scmp.ne.s32.totalorder %s2397_s23, %s2900_s24  ;;  %p2908_p7 = scmp.lt.s32.totalorder %s2900_s24, %s2900_s24 }
 0x70c   : > { %p2902_p4 = pnand %p2901_p3, %p3989_p2  ;;  %p2909_p8 = por %p2908_p7, %p2907_p6 }
 0x70e   : > { %p2903_p5 = pneg %p2902_p4 }
 0x710   : > { %p2910_p9 = pnand %p2909_p8, %p2903_p5 }
 0x712   : > { %2913 = shalt.err (!%p2910_p9)
}
 0x713   : > { %s4067_s27 = sld [smem:[#allocation12_spill]] }
 0x719   : > { %s2914_s19 = scalar_lea.hbm %s4067_s27, 1024 }
 0x71a   : > { %p2915_p10 = scmp.ne.s32.totalorder %s4067_s27, %s2914_s19  ;;  %p2920_p13 = scmp.lt.u32.totalorder %s2914_s19, %s4067_s27 }
 0x71c   : > { %p2916_p11 = pnand %p2915_p10, %p3989_p2 }
 0x71e   : > { %p2917_p12 = pneg %p2916_p11 }
 0x720   : > { %p2922_p0 = pnand %p2920_p13, %p2917_p12 }
 0x722   : > { %2925 = shalt.err (!%p2922_p0)
}
 0x723   : > { %s2984_s15 = smov 128   ;;  %s2985_s29 = smov 8  }
 0x724   : > { %2777 = dma.vmem_to_hbm [thread:$0]  (%p3989_p2), %s2397_s23, 1024, %s4067_s27, [#allocation6], %s2984_s15, %s2984_s15, %s2985_s29  }
 0x725   : > { %2947 = dma.done.wait (%p3989_p2), [#allocation6], 1024  }
 0x726   : > { %2949 = vsyncadd (%p3989_p2), [#allocation6], 4294966272 }
 0x727 PF: > { %s25_s17 = sadd.s32 1, %s2968_s17   ;;  %s4068_s29 = sld [smem:[#allocation8_spill]] }
 0x728   : > { %p22_p1 = scmp.ge.s32.totalorder %s25_s17, 10   ;;  %s4069_s30 = sld [smem:[#allocation9_spill]] }
 0x729   : > { %s4070_s15 = sld [smem:[#allocation10_spill]]  ;;  %s4071_s16 = sld [smem:[#allocation11_spill]] }
 0x72a   :  { %24 = sbr.rel (!%p22_p1) target bundleno = 5 (0x5), region = 129 }
 0x731   :  { %2412 = vsyncpa [#allocation6], 1 }
 0x732   :  { %2414 = vsyncpa [#allocation6 + $0x1], 1 }

</bundles_post_ra>
